<compile_context>
chip_gen: v7x
topology: tpu7x:2x2x1
jax: 0.10.0
libtpu: 0.0.40
codegen_flags: <defaults>
</compile_context>

<pallas_src>
import jax
import jax.numpy as jnp
import numpy as np
from jax import lax
from jax.experimental import pallas as pl
from jax.experimental.pallas import tpu as pltpu

BN_EPS = 1e-5
LANE = 128
TM_TARGET = 512          # review: 512-1024 M tile; fits VMEM with huge margin

# small architecture config, consistent with VAE3D(block, num_layers=2, ...)
NUM_LAYERS = 2
BASE_FILTERS = 8
BLOCKS_PER_LAYER = 1
INIT_DIM = 3
LATENT_DIM = 8


def _round_up(x, m):
    return (x + m - 1) // m * m


def _choose_tm(m):
    # largest-that-fits tile; small M rounds to a 16-row tile (bf16 sublane pack)
    return TM_TARGET if m >= TM_TARGET else _round_up(m, 16)


# ----------------------------- Pallas kernels ------------------------------ #
def _matmul_stats_kernel(a_ref, w_ref, y_ref, sum_ref, ssq_ref):
    """Conv-as-matmul hot path with fused BN-statistics epilogue.

    a_ref:   (TM, K_pad)   bf16 im2col tile (zero padded rows/cols)
    w_ref:   (K_pad, C_pad) bf16 reshaped conv weight
    y_ref:   (TM, C_pad)   f32 conv output tile (lane-dense, 128-wide)
    sum/ssq: (1, 8, C_pad) per-tile partial BN sum / sum-of-squares
    """
    y = jnp.dot(a_ref[...], w_ref[...], preferred_element_type=jnp.float32)
    y_ref[...] = y
    s = jnp.sum(y, axis=0, keepdims=True)          # (1, C_pad)
    q = jnp.sum(y * y, axis=0, keepdims=True)      # (1, C_pad)
    sum_ref[...] = jnp.broadcast_to(s, sum_ref.shape)
    ssq_ref[...] = jnp.broadcast_to(q, ssq_ref.shape)


def _scale_shift_relu_kernel(y_ref, sc_ref, sh_ref, o_ref):
    # folded BatchNorm (train stats) + affine + ReLU:  relu(y*scale + shift)
    o_ref[...] = jnp.maximum(y_ref[...] * sc_ref[...] + sh_ref[...], 0.0)


def _matmul_bias_kernel(a_ref, w_ref, b_ref, o_ref):
    # 1x1 Conv3d (+bias) as a plain matmul; K/C zero-padded to 128 lanes.
    o_ref[...] = (
        jnp.dot(a_ref[...], w_ref[...], preferred_element_type=jnp.float32)
        + b_ref[...]
    )


# -------------------------- Pallas call wrappers ---------------------------- #
def _conv_bn_relu_padded(a_bf16, w_bf16, gamma_pad, beta_pad, m_real, tm):
    """a: [M_pad, K_pad] bf16, w: [K_pad, C_pad] bf16 -> [M_pad, C_pad] f32."""
    m_pad, k_pad = a_bf16.shape
    c_pad = w_bf16.shape[1]
    n_tiles = m_pad // tm

    y, psum, pssq = pl.pallas_call(
        _matmul_stats_kernel,
        out_shape=(
            jax.ShapeDtypeStruct((m_pad, c_pad), jnp.float32),
            jax.ShapeDtypeStruct((n_tiles, 8, c_pad), jnp.float32),
            jax.ShapeDtypeStruct((n_tiles, 8, c_pad), jnp.float32),
        ),
        grid_spec=pltpu.PrefetchScalarGridSpec(
            num_scalar_prefetch=0,
            grid=(n_tiles,),
            in_specs=[
                pl.BlockSpec((tm, k_pad), lambda i: (i, 0)),
                pl.BlockSpec((k_pad, c_pad), lambda i: (0, 0)),
            ],
            out_specs=(
                pl.BlockSpec((tm, c_pad), lambda i: (i, 0)),
                pl.BlockSpec((1, 8, c_pad), lambda i: (i, 0, 0)),
                pl.BlockSpec((1, 8, c_pad), lambda i: (i, 0, 0)),
            ),
        ),
        compiler_params=pltpu.CompilerParams(
            dimension_semantics=("parallel",)),
    )(a_bf16, w_bf16)

    # tiny per-channel reduction + BN folding (C_pad floats) in plain JAX.
    # Zero-padded rows/channels contribute exactly zero (no conv bias), so the
    # statistics only need dividing by the *real* M.
    total = jnp.sum(psum[:, 0, :], axis=0)
    total_sq = jnp.sum(pssq[:, 0, :], axis=0)
    mean = total / float(m_real)
    var = jnp.maximum(total_sq / float(m_real) - mean * mean, 0.0)  # biased var
    inv = lax.rsqrt(var + BN_EPS)
    scale = (inv * gamma_pad)[None, :]
    shift = (beta_pad - mean * inv * gamma_pad)[None, :]

    out = pl.pallas_call(
        _scale_shift_relu_kernel,
        out_shape=jax.ShapeDtypeStruct((m_pad, c_pad), jnp.float32),
        grid_spec=pltpu.PrefetchScalarGridSpec(
            num_scalar_prefetch=0,
            grid=(n_tiles,),
            in_specs=[
                pl.BlockSpec((tm, c_pad), lambda i: (i, 0)),
                pl.BlockSpec((1, c_pad), lambda i: (0, 0)),
                pl.BlockSpec((1, c_pad), lambda i: (0, 0)),
            ],
            out_specs=pl.BlockSpec((tm, c_pad), lambda i: (i, 0)),
        ),
        compiler_params=pltpu.CompilerParams(
            dimension_semantics=("parallel",)),
    )(y, scale, shift)
    return out


def basic_block_ndhwc(x_cl, conv_w, bn_gamma, bn_beta, stride=1):
    """BasicBlock: periodic pad(1) -> Conv3d(3x3x3, stride) -> BN(train) -> ReLU.

    x_cl: [N, D, H, W, Cin] f32 (channels-last).  conv_w: [Cout, Cin, 3, 3, 3].
    The Conv3d bias is omitted: train-mode BatchNorm cancels it exactly.
    """
    n, d, h, w, cin = x_cl.shape
    cout = conv_w.shape[0]
    do = (d - 1) // stride + 1
    ho = (h - 1) // stride + 1
    wo = (w - 1) // stride + 1

    xp = jnp.pad(x_cl, ((0, 0), (1, 1), (1, 1), (1, 1), (0, 0)), mode="wrap")
    xp = xp.astype(jnp.bfloat16)   # bf16 MXU inputs; f32 accumulate in-kernel

    # im2col emitted directly in channels-last (kd, kh, kw, cin) order — a
    # simple shifted-window concat, no stack-then-transpose round trip.
    # TODO(synk): gather the 27 taps inside the Pallas kernel (pl.ds windows on
    # a VMEM-resident padded tile) to avoid materializing the 27x slab in HBM.
    taps = []
    for kd in range(3):
        for kh in range(3):
            for kw in range(3):
                taps.append(
                    xp[:,
                       kd:kd + (do - 1) * stride + 1:stride,
                       kh:kh + (ho - 1) * stride + 1:stride,
                       kw:kw + (wo - 1) * stride + 1:stride,
                       :])
    a = jnp.concatenate(taps, axis=-1).reshape(n * do * ho * wo, 27 * cin)

    m = n * do * ho * wo
    k = 27 * cin
    k_pad = _round_up(k, LANE)
    c_pad = _round_up(cout, LANE)
    tm = _choose_tm(m)
    m_pad = _round_up(m, tm)
    a = jnp.pad(a, ((0, m_pad - m), (0, k_pad - k)))

    # weight -> [K, Cout] in matching (kd, kh, kw, cin) order, zero padded
    w_mat = jnp.transpose(conv_w, (2, 3, 4, 1, 0)).reshape(k, cout)
    w_mat = jnp.pad(w_mat, ((0, k_pad - k), (0, c_pad - cout))).astype(jnp.bfloat16)
    gamma_pad = jnp.pad(bn_gamma.astype(jnp.float32), (0, c_pad - cout))
    beta_pad = jnp.pad(bn_beta.astype(jnp.float32), (0, c_pad - cout))

    out = _conv_bn_relu_padded(a, w_mat, gamma_pad, beta_pad, m, tm)
    return out[:m, :cout].reshape(n, do, ho, wo, cout)


def conv1x1_ndhwc(x_cl, w, b):
    """Conv3d(kernel_size=1) + bias as a Pallas matmul.  w: [Cin, Cout]."""
    n, d, h, wd, cin = x_cl.shape
    cout = w.shape[1]
    m = n * d * h * wd
    k_pad = _round_up(cin, LANE)
    c_pad = _round_up(cout, LANE)
    tm = _choose_tm(m)
    m_pad = _round_up(m, tm)

    a = jnp.pad(x_cl.astype(jnp.float32).reshape(m, cin),
                ((0, m_pad - m), (0, k_pad - cin)))
    w_p = jnp.pad(w.astype(jnp.float32), ((0, k_pad - cin), (0, c_pad - cout)))
    b_p = jnp.pad(b.astype(jnp.float32), (0, c_pad - cout))[None, :]

    y = pl.pallas_call(
        _matmul_bias_kernel,
        out_shape=jax.ShapeDtypeStruct((m_pad, c_pad), jnp.float32),
        grid_spec=pltpu.PrefetchScalarGridSpec(
            num_scalar_prefetch=0,
            grid=(m_pad // tm,),
            in_specs=[
                pl.BlockSpec((tm, k_pad), lambda i: (i, 0)),
                pl.BlockSpec((k_pad, c_pad), lambda i: (0, 0)),
                pl.BlockSpec((1, c_pad), lambda i: (0, 0)),
            ],
            out_specs=pl.BlockSpec((tm, c_pad), lambda i: (i, 0)),
        ),
        compiler_params=pltpu.CompilerParams(
            dimension_semantics=("parallel",)),
    )(a, w_p, b_p)
    return y[:m, :cout].reshape(n, d, h, wd, cout)


# ------------------------------ non-Pallas glue ----------------------------- #
def crop_3d_ndhwc(x):
    # crop_tensor: narrow each spatial dim to size-3 starting at index 1
    return x[:, 1:x.shape[1] - 2, 1:x.shape[2] - 2, 1:x.shape[3] - 2, :]


def conv_transpose3d_ndhwc(x, wt, b):
    """PyTorch ConvTranspose3d(k=3, stride=2, padding=0).  wt: [Cin, Cout, 3,3,3].
    # TODO(synk): ConvTranspose3d left to XLA (lhs-dilated conv); no clean single Pallas kernel here.
    """
    rhs = jnp.transpose(wt[:, :, ::-1, ::-1, ::-1], (2, 3, 4, 0, 1))  # DHWIO, flipped
    y = lax.conv_general_dilated(
        x, rhs, window_strides=(1, 1, 1),
        padding=((2, 2), (2, 2), (2, 2)),
        lhs_dilation=(2, 2, 2),
        dimension_numbers=("NDHWC", "DHWIO", "NDHWC"),
        precision=lax.Precision.HIGHEST)
    return y + b[None, None, None, None, :]


# ------------------------------ VAE3D forward ------------------------------- #
def vae3d_forward(params, x_ncdhw, eps):
    """x: [N, init_dim, D, H, W] (NCDHW).  Internally channels-last (NDHWC), so
    layout transposes happen only at the model boundary (review item)."""
    x = jnp.transpose(x_ncdhw, (0, 2, 3, 4, 1))

    for blk in params["init_conv"]:
        x = basic_block_ndhwc(x, blk["w"], blk["gamma"], blk["beta"], stride=1)

    for layer in params["encoders"]:
        for blk in layer["down"]:
            x = basic_block_ndhwc(x, blk["w"], blk["gamma"], blk["beta"], stride=2)
        for blk in layer["same"]:
            x = basic_block_ndhwc(x, blk["w"], blk["gamma"], blk["beta"], stride=1)

    mu = conv1x1_ndhwc(x, params["conv_mu"]["w"], params["conv_mu"]["b"])
    logvar = conv1x1_ndhwc(x, params["conv_logvar"]["w"], params["conv_logvar"]["b"])

    # reparameterize  # TODO(synk): Gaussian sampling / elementwise left to XLA.
    z = mu + eps * jnp.exp(0.5 * logvar)

    x = conv1x1_ndhwc(z, params["conv_decode"]["w"], params["conv_decode"]["b"])

    for layer in params["decoders"]:
        # periodic_padding_3d(x, pad=(0,1,0,1,0,1)): circular pad 1 after W,H,D
        x = jnp.pad(x, ((0, 0), (0, 1), (0, 1), (0, 1), (0, 0)), mode="wrap")
        x = conv_transpose3d_ndhwc(x, layer["convT"]["w"], layer["convT"]["b"])
        x = crop_3d_ndhwc(x)
        for blk in layer["same"]:
            x = basic_block_ndhwc(x, blk["w"], blk["gamma"], blk["beta"], stride=1)

    x = conv1x1_ndhwc(x, params["final_conv"]["w"], params["final_conv"]["b"])

    to_ncdhw = lambda t: jnp.transpose(t, (0, 4, 1, 2, 3))
    return to_ncdhw(x), to_ncdhw(mu), to_ncdhw(logvar)


# ------------------------------ parameter init ------------------------------ #
def _init_block_params(key, cin, cout):
    kw, kg, kb = jax.random.split(key, 3)
    bound = 1.0 / np.sqrt(cin * 27)
    return {
        # NOTE: Conv3d bias omitted — cancelled exactly by train-mode BatchNorm.
        "w": jax.random.uniform(kw, (cout, cin, 3, 3, 3), jnp.float32, -bound, bound),
        "gamma": 1.0 + 0.1 * jax.random.normal(kg, (cout,), jnp.float32),
        "beta": 0.1 * jax.random.normal(kb, (cout,), jnp.float32),
    }


def _init_conv1x1_params(key, cin, cout):
    kw, kb = jax.random.split(key)
    bound = 1.0 / np.sqrt(cin)
    return {"w": jax.random.uniform(kw, (cin, cout), jnp.float32, -bound, bound),
            "b": jax.random.uniform(kb, (cout,), jnp.float32, -bound, bound)}


def _init_convT_params(key, cin, cout):
    kw, kb = jax.random.split(key)
    bound = 1.0 / np.sqrt(cin * 27)
    return {"w": jax.random.uniform(kw, (cin, cout, 3, 3, 3), jnp.float32, -bound, bound),
            "b": jax.random.uniform(kb, (cout,), jnp.float32, -bound, bound)}


def init_vae_params(key):
    keys = iter(jax.random.split(key, 128))
    params = {}
    blocks, cin = [], INIT_DIM
    for _ in range(BLOCKS_PER_LAYER):
        blocks.append(_init_block_params(next(keys), cin, BASE_FILTERS))
        cin = BASE_FILTERS
    params["init_conv"] = blocks

    ch, enc = BASE_FILTERS, []
    for _ in range(NUM_LAYERS):
        down = [_init_block_params(next(keys), ch, ch * 2)]       # blocks=1, stride 2
        same, c = [], ch * 2
        for _ in range(BLOCKS_PER_LAYER):
            same.append(_init_block_params(next(keys), c, c))
        enc.append({"down": down, "same": same})
        ch *= 2
    params["encoders"] = enc

    params["conv_mu"] = _init_conv1x1_params(next(keys), ch, LATENT_DIM)
    params["conv_logvar"] = _init_conv1x1_params(next(keys), ch, LATENT_DIM)
    params["conv_decode"] = _init_conv1x1_params(next(keys), LATENT_DIM, ch)

    dec = []
    for _ in range(NUM_LAYERS):
        convt = _init_convT_params(next(keys), ch, ch // 2)
        same, c = [], ch // 2
        for _ in range(BLOCKS_PER_LAYER):
            same.append(_init_block_params(next(keys), c, c))
        dec.append({"convT": convt, "same": same})
        ch //= 2
    params["decoders"] = dec
    params["final_conv"] = _init_conv1x1_params(next(keys), ch, INIT_DIM)
    return params


# -------------------------------- references -------------------------------- #
def basic_block_reference_ndhwc(x_cl, conv_w, gamma, beta, stride=1):
    """Pure-XLA reference (same bf16 input rounding as the Pallas matmul path)."""
    xp = jnp.pad(x_cl, ((0, 0), (1, 1), (1, 1), (1, 1), (0, 0)), mode="wrap")
    xp = xp.astype(jnp.bfloat16).astype(jnp.float32)
    rhs = jnp.transpose(conv_w, (2, 3, 4, 1, 0)).astype(jnp.bfloat16).astype(jnp.float32)
    y = lax.conv_general_dilated(
        xp, rhs, window_strides=(stride,) * 3, padding="VALID",
        dimension_numbers=("NDHWC", "DHWIO", "NDHWC"),
        precision=lax.Precision.HIGHEST)
    mean = jnp.mean(y, axis=(0, 1, 2, 3), keepdims=True)
    var = jnp.mean((y - mean) ** 2, axis=(0, 1, 2, 3), keepdims=True)
    yn = (y - mean) * lax.rsqrt(var + BN_EPS) * gamma + beta
    return jnp.maximum(yn, 0.0)


# ----------------------------------- main ----------------------------------- #
if __name__ == "__main__":
    root = jax.random.PRNGKey(0)
    kp, kx, keps, k1, k2, k3, k4, k5, k6, k7, k8 = jax.random.split(root, 11)

    # (a) BasicBlock unit check, stride 1, Cin=4 -> Cout=8, spatial 9
    #     (exercises K=108->128 padding AND M=729 -> 1024 zero-row padding)
    xb = jax.random.normal(k1, (1, 9, 9, 9, 4), jnp.float32)
    wb = 0.2 * jax.random.normal(k2, (8, 4, 3, 3, 3), jnp.float32)
    gb = 1.0 + 0.1 * jax.random.normal(k3, (8,), jnp.float32)
    bb = 0.1 * jax.random.normal(k4, (8,), jnp.float32)
    out1 = jax.jit(lambda a, w, g, b: basic_block_ndhwc(a, w, g, b, stride=1))(xb, wb, gb, bb)
    ref1 = basic_block_reference_ndhwc(xb, wb, gb, bb, stride=1)
    np.testing.assert_allclose(np.asarray(out1), np.asarray(ref1), atol=2e-2, rtol=2e-2)

    # (b) BasicBlock unit check, stride 2, Cin=8 -> Cout=16, spatial 8
    xc = jax.random.normal(k5, (2, 8, 8, 8, 8), jnp.float32)
    wc = 0.1 * jax.random.normal(k6, (16, 8, 3, 3, 3), jnp.float32)
    gc = 1.0 + 0.1 * jax.random.normal(k7, (16,), jnp.float32)
    bc = 0.1 * jax.random.normal(k8, (16,), jnp.float32)
    out2 = jax.jit(lambda a, w, g, b: basic_block_ndhwc(a, w, g, b, stride=2))(xc, wc, gc, bc)
    ref2 = basic_block_reference_ndhwc(xc, wc, gc, bc, stride=2)
    np.testing.assert_allclose(np.asarray(out2), np.asarray(ref2), atol=2e-2, rtol=2e-2)

    # (c) 1x1-conv Pallas matmul vs einsum
    x11 = jax.random.normal(k1, (2, 2, 2, 2, 32), jnp.float32)
    w11 = 0.2 * jax.random.normal(k2, (32, 8), jnp.float32)
    b11 = 0.1 * jax.random.normal(k3, (8,), jnp.float32)
    out3 = jax.jit(conv1x1_ndhwc)(x11, w11, b11)
    ref3 = jnp.einsum("ndhwc,co->ndhwo", x11, w11,
                      precision=lax.Precision.HIGHEST) + b11
    np.testing.assert_allclose(np.asarray(out3), np.asarray(ref3), atol=1e-3, rtol=1e-3)

    # ------------------------- full VAE3D forward ---------------------------
    N, S = 2, 8
    x = jax.random.normal(kx, (N, INIT_DIM, S, S, S), jnp.float32)
    params = init_vae_params(kp)
    s_lat = S
    for _ in range(NUM_LAYERS):
        s_lat = (s_lat - 1) // 2 + 1
    eps = jax.random.normal(keps, (N, s_lat, s_lat, s_lat, LATENT_DIM), jnp.float32)

    fwd = jax.jit(vae3d_forward)
    x_rec, mu, logvar = jax.block_until_ready(fwd(params, x, eps))

    assert x_rec.shape == (N, INIT_DIM, S, S, S), x_rec.shape
    assert mu.shape == (N, LATENT_DIM, s_lat, s_lat, s_lat), mu.shape
    assert logvar.shape == (N, LATENT_DIM, s_lat, s_lat, s_lat), logvar.shape
    for name, arr in (("x", x_rec), ("mu", mu), ("logvar", logvar)):
        assert np.all(np.isfinite(np.asarray(arr))), name

    print("KERNEL_OK")
</pallas_src>

<mosaic_0001>
module attributes {stable_mosaic.version = 11 : i64} {
  func.func @_matmul_stats_kernel(%arg0: i32, %arg1: memref<512x128xbf16, #tpu.memory_space<vmem>>, %arg2: memref<128x128xbf16, #tpu.memory_space<vmem>>, %arg3: memref<512x128xf32, #tpu.memory_space<vmem>>, %arg4: memref<1x8x128xf32, #tpu.memory_space<vmem>>, %arg5: memref<1x8x128xf32, #tpu.memory_space<vmem>>) attributes {dimension_semantics = [#tpu.dimension_semantics<parallel>], iteration_bounds = array<i64: 2>, scalar_prefetch = 0 : i64, scratch_operands = 0 : i64, tpu.core_type = #tpu.core_type<tc>, window_params = [{transform_indices = @transform_0, window_bounds = array<i64: 512, 128>}, {pipeline_mode = #tpu.pipeline_mode<synchronous>, transform_indices = @transform_1, window_bounds = array<i64: 128, 128>}, {transform_indices = @transform_2, window_bounds = array<i64: 512, 128>}, {transform_indices = @transform_3, window_bounds = array<i64: 1, 8, 128>}, {transform_indices = @transform_4, window_bounds = array<i64: 1, 8, 128>}]} {
    %c0 = arith.constant 0 : index
    %c0_0 = arith.constant 0 : index
    %0 = vector.load %arg1[%c0, %c0_0] : memref<512x128xbf16, #tpu.memory_space<vmem>>, vector<512x128xbf16>
    %c0_1 = arith.constant 0 : index
    %c0_2 = arith.constant 0 : index
    %1 = vector.load %arg2[%c0_1, %c0_2] : memref<128x128xbf16, #tpu.memory_space<vmem>>, vector<128x128xbf16>
    %cst = arith.constant dense<0.000000e+00> : vector<512x128xf32>
    %2 = tpu.matmul %0, %1, %cst {dimension_numbers = #tpu.dot_dimension_numbers<[1], [0], [0], [1], [0, 0, 1, 1], [], []>} : vector<512x128xbf16>, vector<128x128xbf16>, vector<512x128xf32> -> vector<512x128xf32>
    %c0_3 = arith.constant 0 : index
    %c0_4 = arith.constant 0 : index
    %3 = vector.load %arg3[%c0_3, %c0_4] : memref<512x128xf32, #tpu.memory_space<vmem>>, vector<512x128xf32>
    tpu.vector_store %arg3[%c0_3, %c0_4], %2 {strides = array<i32>} : memref<512x128xf32, #tpu.memory_space<vmem>>, vector<512x128xf32>,
    %cst_5 = arith.constant dense<0.000000e+00> : vector<128xf32>
    %4 = vector.multi_reduction <add>, %2, %cst_5 [0] : vector<512x128xf32> to vector<128xf32>
    %5 = vector.shape_cast %4 : vector<128xf32> to vector<1x128xf32>
    %6 = arith.mulf %2, %2 : vector<512x128xf32>
    %cst_6 = arith.constant dense<0.000000e+00> : vector<128xf32>
    %7 = vector.multi_reduction <add>, %6, %cst_6 [0] : vector<512x128xf32> to vector<128xf32>
    %8 = vector.shape_cast %7 : vector<128xf32> to vector<1x128xf32>
    %9 = vector.shape_cast %5 : vector<1x128xf32> to vector<1x1x128xf32>
    %10 = vector.broadcast %9 : vector<1x1x128xf32> to vector<1x8x128xf32>
    %c0_7 = arith.constant 0 : index
    %c0_8 = arith.constant 0 : index
    %c0_9 = arith.constant 0 : index
    %11 = vector.load %arg4[%c0_7, %c0_8, %c0_9] : memref<1x8x128xf32, #tpu.memory_space<vmem>>, vector<1x8x128xf32>
    tpu.vector_store %arg4[%c0_7, %c0_8, %c0_9], %10 {strides = array<i32>} : memref<1x8x128xf32, #tpu.memory_space<vmem>>, vector<1x8x128xf32>,
    %12 = vector.shape_cast %8 : vector<1x128xf32> to vector<1x1x128xf32>
    %13 = vector.broadcast %12 : vector<1x1x128xf32> to vector<1x8x128xf32>
    %c0_10 = arith.constant 0 : index
    %c0_11 = arith.constant 0 : index
    %c0_12 = arith.constant 0 : index
    %14 = vector.load %arg5[%c0_10, %c0_11, %c0_12] : memref<1x8x128xf32, #tpu.memory_space<vmem>>, vector<1x8x128xf32>
    tpu.vector_store %arg5[%c0_10, %c0_11, %c0_12], %13 {strides = array<i32>} : memref<1x8x128xf32, #tpu.memory_space<vmem>>, vector<1x8x128xf32>,
    return
  }
  func.func @transform_0(%arg0: i32) -> (i32, i32) {
    %c0_i32 = arith.constant 0 : i32
    %c0_i32_0 = arith.constant 0 : i32
    return %arg0, %c0_i32 : i32, i32
  }
  func.func @transform_1(%arg0: i32) -> (i32, i32) {
    %c0_i32 = arith.constant 0 : i32
    %c0_i32_0 = arith.constant 0 : i32
    %c0_i32_1 = arith.constant 0 : i32
    return %c0_i32, %c0_i32_0 : i32, i32
  }
  func.func @transform_2(%arg0: i32) -> (i32, i32) {
    %c0_i32 = arith.constant 0 : i32
    %c0_i32_0 = arith.constant 0 : i32
    return %arg0, %c0_i32 : i32, i32
  }
  func.func @transform_3(%arg0: i32) -> (i32, i32, i32) {
    %c0_i32 = arith.constant 0 : i32
    %c0_i32_0 = arith.constant 0 : i32
    %c0_i32_1 = arith.constant 0 : i32
    return %arg0, %c0_i32, %c0_i32_0 : i32, i32, i32
  }
  func.func @transform_4(%arg0: i32) -> (i32, i32, i32) {
    %c0_i32 = arith.constant 0 : i32
    %c0_i32_0 = arith.constant 0 : i32
    %c0_i32_1 = arith.constant 0 : i32
    return %arg0, %c0_i32, %c0_i32_0 : i32, i32, i32
  }
}

module attributes {stable_mosaic.version = 11 : i64} {
  func.func @_scale_shift_relu_kernel(%arg0: i32, %arg1: memref<512x128xf32, #tpu.memory_space<vmem>>, %arg2: memref<1x128xf32, #tpu.memory_space<vmem>>, %arg3: memref<1x128xf32, #tpu.memory_space<vmem>>, %arg4: memref<512x128xf32, #tpu.memory_space<vmem>>) attributes {dimension_semantics = [#tpu.dimension_semantics<parallel>], iteration_bounds = array<i64: 2>, scalar_prefetch = 0 : i64, scratch_operands = 0 : i64, tpu.core_type = #tpu.core_type<tc>, window_params = [{transform_indices = @transform_0, window_bounds = array<i64: 512, 128>}, {pipeline_mode = #tpu.pipeline_mode<synchronous>, transform_indices = @transform_1, window_bounds = array<i64: 1, 128>}, {pipeline_mode = #tpu.pipeline_mode<synchronous>, transform_indices = @transform_2, window_bounds = array<i64: 1, 128>}, {transform_indices = @transform_3, window_bounds = array<i64: 512, 128>}]} {
    %c0 = arith.constant 0 : index
    %c0_0 = arith.constant 0 : index
    %0 = vector.load %arg1[%c0, %c0_0] : memref<512x128xf32, #tpu.memory_space<vmem>>, vector<512x128xf32>
    %c0_1 = arith.constant 0 : index
    %c0_2 = arith.constant 0 : index
    %1 = vector.load %arg2[%c0_1, %c0_2] : memref<1x128xf32, #tpu.memory_space<vmem>>, vector<1x128xf32>
    %2 = vector.broadcast %1 : vector<1x128xf32> to vector<512x128xf32>
    %3 = arith.mulf %0, %2 : vector<512x128xf32>
    %c0_3 = arith.constant 0 : index
    %c0_4 = arith.constant 0 : index
    %4 = vector.load %arg3[%c0_3, %c0_4] : memref<1x128xf32, #tpu.memory_space<vmem>>, vector<1x128xf32>
    %5 = vector.broadcast %4 : vector<1x128xf32> to vector<512x128xf32>
    %6 = arith.addf %3, %5 : vector<512x128xf32>
    %cst = arith.constant 0.000000e+00 : f32
    %7 = vector.broadcast %cst : f32 to vector<512x128xf32>
    %8 = arith.maximumf %6, %7 : vector<512x128xf32>
    %c0_5 = arith.constant 0 : index
    %c0_6 = arith.constant 0 : index
    %9 = vector.load %arg4[%c0_5, %c0_6] : memref<512x128xf32, #tpu.memory_space<vmem>>, vector<512x128xf32>
    tpu.vector_store %arg4[%c0_5, %c0_6], %8 {strides = array<i32>} : memref<512x128xf32, #tpu.memory_space<vmem>>, vector<512x128xf32>,
    return
  }
  func.func @transform_0(%arg0: i32) -> (i32, i32) {
    %c0_i32 = arith.constant 0 : i32
    %c0_i32_0 = arith.constant 0 : i32
    return %arg0, %c0_i32 : i32, i32
  }
  func.func @transform_1(%arg0: i32) -> (i32, i32) {
    %c0_i32 = arith.constant 0 : i32
    %c0_i32_0 = arith.constant 0 : i32
    %c0_i32_1 = arith.constant 0 : i32
    return %c0_i32, %c0_i32_0 : i32, i32
  }
  func.func @transform_2(%arg0: i32) -> (i32, i32) {
    %c0_i32 = arith.constant 0 : i32
    %c0_i32_0 = arith.constant 0 : i32
    %c0_i32_1 = arith.constant 0 : i32
    return %c0_i32, %c0_i32_0 : i32, i32
  }
  func.func @transform_3(%arg0: i32) -> (i32, i32) {
    %c0_i32 = arith.constant 0 : i32
    %c0_i32_0 = arith.constant 0 : i32
    return %arg0, %c0_i32 : i32, i32
  }
}

</mosaic_0001>

<bundles_post_ra>
// kernel: _lambda_.3
= control target key start
LH: loop header
LB: loop body
LE: loop exit
PB: predicated region body
PF: predicated region fallthrough
CT: control target
= control target key end

     0   :  { %s613_s12 = smov 0   ;;  %s900_s0 = inlined_call_operand.vmem [shape: f32[1024,128], index: 0, kind: input, shape index: {}]   ;;  %s901_s1 = inlined_call_operand.vmem [shape: f32[1,128], index: 1, kind: input, shape index: {}]   ;;  %s902_s2 = inlined_call_operand.vmem [shape: f32[1,128], index: 2, kind: input, shape index: {}]   ;;  %s903_s3 = inlined_call_operand.vmem [shape: f32[1024,128], index: 3, kind: output, shape index: {}]  }
   0x1 LB: > { %s564_s13 = sadd.s32 4294967295, %s591_s12   ;;  %p568_p0 = scmp.ge.s32.totalorder %s591_s12, 1  ;;  %s591_s12 = sphi %s613_s12, %s13_s12  }
   0x2   : > { %p138_p1 = scmp.lt.s32.totalorder %s591_s12, 3 }
   0x4   : > { %p139_p2 = pnand %p568_p0, %p138_p1 }
   0x5   : > { %s569_s14 = sshll.u32 (!%p139_p2), %s564_s13, 6  ;;  %v624_v0 = vld [vmem:[%s901_s1] ss:$0 sm:$0xff] (!%p139_p2) }
   0x6   : > { %142 = sbr.rel (%p139_p2) target bundleno = 70 (0x46), region = 32  ;;  %p163_p3 = scmp.lt.s32.totalorder (!%p139_p2), %s569_s14, 127  ;;  %v634_v1 = vld [vmem:[%s902_s2] ss:$0 sm:$0xff] (!%p139_p2) }
   0xd   : > { %s905_s14 = smov (!%p163_p3, %s569_s14), 127 }
   0xe   : > { %s570_s15 = sshll.u32 %s905_s14, 3 }
   0xf   : > { %s629_s20 = scalar_lea.vmem %s900_s0, %s570_s15  ;;  %s657_s25 = scalar_lea.vmem %s903_s3, %s570_s15 }
  0x10   : > { %v174_v2 = vld [vmem:[%s629_s20] sm:$0xff]  ;;  %v175_v3 = vld [vmem:[%s629_s20 + $0x8] sm:$0xff]  ;;  %v176_v4 = vld [vmem:[%s629_s20 + $0x10] sm:$0xff] }
  0x11   : > { %v245_v5 = vmul.f32 %v624_v0, %v174_v2  ;;  %v246_v6 = vmul.f32 %v624_v0, %v175_v3  ;;  %v247_v7 = vmul.f32 %v624_v0, %v176_v4  ;;  %v177_v8 = vld [vmem:[%s629_s20 + $0x18] sm:$0xff]  ;;  %v178_v9 = vld [vmem:[%s629_s20 + $0x20] sm:$0xff]  ;;  %v179_v10 = vld [vmem:[%s629_s20 + $0x28] sm:$0xff] }
  0x12   : > { %v248_v11 = vmul.f32 %v624_v0, %v177_v8  ;;  %v249_v12 = vmul.f32 %v624_v0, %v178_v9  ;;  %v250_v13 = vmul.f32 %v624_v0, %v179_v10  ;;  %v180_v14 = vld [vmem:[%s629_s20 + $0x30] sm:$0xff]  ;;  %v181_v15 = vld [vmem:[%s629_s20 + $0x38] sm:$0xff]  ;;  %v182_v24 = vld [vmem:[%s629_s20 + $0x40] sm:$0xff] }
  0x13   : > { %v316_v16 = vadd.f32 %v634_v1, %v245_v5  ;;  %v317_v17 = vadd.f32 %v634_v1, %v246_v6  ;;  %v318_v18 = vadd.f32 %v634_v1, %v247_v7  ;;  %v251_v19 = vmul.f32 %v624_v0, %v180_v14  ;;  %v183_v25 = vld [vmem:[%s629_s20 + $0x48] sm:$0xff]  ;;  %v184_v26 = vld [vmem:[%s629_s20 + $0x50] sm:$0xff]  ;;  %v185_v31 = vld [vmem:[%s629_s20 + $0x58] sm:$0xff] }
  0x14   : > { %v319_v20 = vadd.f32 %v634_v1, %v248_v11  ;;  %v320_v21 = vadd.f32 %v634_v1, %v249_v12  ;;  %v321_v22 = vadd.f32 %v634_v1, %v250_v13  ;;  %v252_v23 = vmul.f32 %v624_v0, %v181_v15  ;;  %v186_v32 = vld [vmem:[%s629_s20 + $0x60] sm:$0xff]  ;;  %v187_v33 = vld [vmem:[%s629_s20 + $0x68] sm:$0xff]  ;;  %v188_v38 = vld [vmem:[%s629_s20 + $0x70] sm:$0xff] }
  0x15   : > { %v380_v27 = vmax.f32 %v316_v16, 0.0  ;;  %v381_v28 = vmax.f32 %v317_v17, 0.0  ;;  %v382_v29 = vmax.f32 %v318_v18, 0.0  ;;  %v322_v30 = vadd.f32 %v634_v1, %v251_v19  ;;  %v189_v43 = vld [vmem:[%s629_s20 + $0x78] sm:$0xff]  ;;  %v190_v56 = vld [vmem:[%s629_s20 + $0x80] sm:$0xff]  ;;  %v191_v57 = vld [vmem:[%s629_s20 + $0x88] sm:$0xff] }
  0x16   : > { %v383_v34 = vmax.f32 %v319_v20, 0.0  ;;  %v384_v35 = vmax.f32 %v320_v21, 0.0  ;;  %v385_v36 = vmax.f32 %v321_v22, 0.0  ;;  %v323_v37 = vadd.f32 %v634_v1, %v252_v23  ;;  %v192_v58 = vld [vmem:[%s629_s20 + $0x90] sm:$0xff]  ;;  %v193_v63 = vld [vmem:[%s629_s20 + $0x98] sm:$0xff]  ;;  %v194_v2 = vld [vmem:[%s629_s20 + $0xa0] sm:$0xff] }
  0x17   : > { %444 = vst [vmem:[%s657_s25] sm:$0xff] %v380_v27  ;;  %445 = vst [vmem:[%s657_s25 + $0x8] sm:$0xff] %v381_v28  ;;  %v386_v39 = vmax.f32 %v322_v30, 0.0  ;;  %v253_v40 = vmul.f32 %v624_v0, %v182_v24  ;;  %v254_v41 = vmul.f32 %v624_v0, %v183_v25  ;;  %v255_v42 = vmul.f32 %v624_v0, %v184_v26  ;;  %v195_v3 = vld [vmem:[%s629_s20 + $0xa8] sm:$0xff]  ;;  %v196_v8 = vld [vmem:[%s629_s20 + $0xb0] sm:$0xff] }
  0x18   : > { %446 = vst [vmem:[%s657_s25 + $0x10] sm:$0xff] %v382_v29  ;;  %447 = vst [vmem:[%s657_s25 + $0x18] sm:$0xff] %v383_v34  ;;  %v387_v44 = vmax.f32 %v323_v37, 0.0  ;;  %v256_v45 = vmul.f32 %v624_v0, %v185_v31  ;;  %v257_v46 = vmul.f32 %v624_v0, %v186_v32  ;;  %v258_v47 = vmul.f32 %v624_v0, %v187_v33  ;;  %v197_v13 = vld [vmem:[%s629_s20 + $0xb8] sm:$0xff]  ;;  %v198_v26 = vld [vmem:[%s629_s20 + $0xc0] sm:$0xff] }
  0x19   : > { %448 = vst [vmem:[%s657_s25 + $0x20] sm:$0xff] %v384_v35  ;;  %449 = vst [vmem:[%s657_s25 + $0x28] sm:$0xff] %v385_v36  ;;  %v324_v48 = vadd.f32 %v634_v1, %v253_v40  ;;  %v325_v49 = vadd.f32 %v634_v1, %v254_v41  ;;  %v326_v50 = vadd.f32 %v634_v1, %v255_v42  ;;  %v199_v27 = vld [vmem:[%s629_s20 + $0xc8] sm:$0xff]  ;;  %v200_v28 = vld [vmem:[%s629_s20 + $0xd0] sm:$0xff] }
  0x1a   : > { %450 = vst [vmem:[%s657_s25 + $0x30] sm:$0xff] %v386_v39  ;;  %v259_v51 = vmul.f32 %v624_v0, %v188_v38  ;;  %451 = vst [vmem:[%s657_s25 + $0x38] sm:$0xff] %v387_v44  ;;  %v327_v52 = vadd.f32 %v634_v1, %v256_v45  ;;  %v328_v53 = vadd.f32 %v634_v1, %v257_v46  ;;  %v201_v33 = vld [vmem:[%s629_s20 + $0xd8] sm:$0xff]  ;;  %v202_v34 = vld [vmem:[%s629_s20 + $0xe0] sm:$0xff] }
  0x1b   : > { %v329_v54 = vadd.f32 %v634_v1, %v258_v47  ;;  %v260_v55 = vmul.f32 %v624_v0, %v189_v43  ;;  %v388_v59 = vmax.f32 %v324_v48, 0.0  ;;  %v389_v60 = vmax.f32 %v325_v49, 0.0  ;;  %v203_v35 = vld [vmem:[%s629_s20 + $0xe8] sm:$0xff]  ;;  %v204_v40 = vld [vmem:[%s629_s20 + $0xf0] sm:$0xff]  ;;  %v205_v45 = vld [vmem:[%s629_s20 + $0xf8] sm:$0xff] }
  0x1c   : > { %v390_v61 = vmax.f32 %v326_v50, 0.0  ;;  %v330_v62 = vadd.f32 %v634_v1, %v259_v51  ;;  %v391_v4 = vmax.f32 %v327_v52, 0.0  ;;  %v392_v5 = vmax.f32 %v328_v53, 0.0 }
  0x1d   : > { %v393_v6 = vmax.f32 %v329_v54, 0.0  ;;  %v331_v7 = vadd.f32 %v634_v1, %v260_v55  ;;  %452 = vst [vmem:[%s657_s25 + $0x40] sm:$0xff] %v388_v59  ;;  %453 = vst [vmem:[%s657_s25 + $0x48] sm:$0xff] %v389_v60  ;;  %v261_v10 = vmul.f32 %v624_v0, %v190_v56  ;;  %v262_v11 = vmul.f32 %v624_v0, %v191_v57  ;;  %v207_v59 = vld [vmem:[%s629_s20 + $0x108] sm:$0xff]  ;;  %v208_v60 = vld [vmem:[%s629_s20 + $0x110] sm:$0xff] }
  0x1e   : > { %454 = vst [vmem:[%s657_s25 + $0x50] sm:$0xff] %v390_v61  ;;  %v394_v9 = vmax.f32 %v330_v62, 0.0  ;;  %v263_v12 = vmul.f32 %v624_v0, %v192_v58  ;;  %455 = vst [vmem:[%s657_s25 + $0x58] sm:$0xff] %v391_v4  ;;  %v264_v15 = vmul.f32 %v624_v0, %v193_v63  ;;  %v265_v16 = vmul.f32 %v624_v0, %v194_v2  ;;  %v206_v58 = vld [vmem:[%s629_s20 + $0x100] sm:$0xff] }
  0x1f   : > { %456 = vst [vmem:[%s657_s25 + $0x60] sm:$0xff] %v392_v5  ;;  %457 = vst [vmem:[%s657_s25 + $0x68] sm:$0xff] %v393_v6  ;;  %v395_v14 = vmax.f32 %v331_v7, 0.0  ;;  %v266_v17 = vmul.f32 %v624_v0, %v195_v3  ;;  %v332_v18 = vadd.f32 %v634_v1, %v261_v10  ;;  %v333_v19 = vadd.f32 %v634_v1, %v262_v11  ;;  %v209_v3 = vld [vmem:[%s629_s20 + $0x118] sm:$0xff]  ;;  %v210_v4 = vld [vmem:[%s629_s20 + $0x120] sm:$0xff] }
  0x20   : > { %458 = vst [vmem:[%s657_s25 + $0x70] sm:$0xff] %v394_v9  ;;  %v334_v20 = vadd.f32 %v634_v1, %v263_v12  ;;  %v267_v21 = vmul.f32 %v624_v0, %v196_v8  ;;  %v335_v22 = vadd.f32 %v634_v1, %v264_v15  ;;  %v336_v23 = vadd.f32 %v634_v1, %v265_v16  ;;  %v211_v5 = vld [vmem:[%s629_s20 + $0x128] sm:$0xff]  ;;  %v212_v10 = vld [vmem:[%s629_s20 + $0x130] sm:$0xff]  ;;  %v213_v15 = vld [vmem:[%s629_s20 + $0x138] sm:$0xff] }
  0x21   : > { %459 = vst [vmem:[%s657_s25 + $0x78] sm:$0xff] %v395_v14  ;;  %v337_v24 = vadd.f32 %v634_v1, %v266_v17  ;;  %v268_v25 = vmul.f32 %v624_v0, %v197_v13  ;;  %v396_v29 = vmax.f32 %v332_v18, 0.0  ;;  %v397_v30 = vmax.f32 %v333_v19, 0.0 }
  0x22   : > { %v398_v31 = vmax.f32 %v334_v20, 0.0  ;;  %v338_v32 = vadd.f32 %v634_v1, %v267_v21  ;;  %v399_v36 = vmax.f32 %v335_v22, 0.0  ;;  %v400_v37 = vmax.f32 %v336_v23, 0.0 }
  0x23   : > { %v401_v38 = vmax.f32 %v337_v24, 0.0  ;;  %v339_v39 = vadd.f32 %v634_v1, %v268_v25  ;;  %460 = vst [vmem:[%s657_s25 + $0x80] sm:$0xff] %v396_v29  ;;  %461 = vst [vmem:[%s657_s25 + $0x88] sm:$0xff] %v397_v30  ;;  %v269_v42 = vmul.f32 %v624_v0, %v198_v26  ;;  %v270_v43 = vmul.f32 %v624_v0, %v199_v27  ;;  %v215_v29 = vld [vmem:[%s629_s20 + $0x148] sm:$0xff]  ;;  %v216_v30 = vld [vmem:[%s629_s20 + $0x150] sm:$0xff] }
  0x24   : > { %462 = vst [vmem:[%s657_s25 + $0x90] sm:$0xff] %v398_v31  ;;  %v402_v41 = vmax.f32 %v338_v32, 0.0  ;;  %v271_v44 = vmul.f32 %v624_v0, %v200_v28  ;;  %463 = vst [vmem:[%s657_s25 + $0x98] sm:$0xff] %v399_v36  ;;  %v272_v47 = vmul.f32 %v624_v0, %v201_v33  ;;  %v273_v48 = vmul.f32 %v624_v0, %v202_v34  ;;  %v214_v28 = vld [vmem:[%s629_s20 + $0x140] sm:$0xff] }
  0x25   : > { %464 = vst [vmem:[%s657_s25 + $0xa0] sm:$0xff] %v400_v37  ;;  %465 = vst [vmem:[%s657_s25 + $0xa8] sm:$0xff] %v401_v38  ;;  %v403_v46 = vmax.f32 %v339_v39, 0.0  ;;  %v274_v49 = vmul.f32 %v624_v0, %v203_v35  ;;  %v340_v50 = vadd.f32 %v634_v1, %v269_v42  ;;  %v341_v51 = vadd.f32 %v634_v1, %v270_v43  ;;  %v217_v35 = vld [vmem:[%s629_s20 + $0x158] sm:$0xff]  ;;  %v218_v36 = vld [vmem:[%s629_s20 + $0x160] sm:$0xff] }
  0x26   : > { %466 = vst [vmem:[%s657_s25 + $0xb0] sm:$0xff] %v402_v41  ;;  %v342_v52 = vadd.f32 %v634_v1, %v271_v44  ;;  %v275_v53 = vmul.f32 %v624_v0, %v204_v40  ;;  %v343_v54 = vadd.f32 %v634_v1, %v272_v47  ;;  %v344_v55 = vadd.f32 %v634_v1, %v273_v48  ;;  %v219_v37 = vld [vmem:[%s629_s20 + $0x168] sm:$0xff]  ;;  %v220_v42 = vld [vmem:[%s629_s20 + $0x170] sm:$0xff]  ;;  %v221_v47 = vld [vmem:[%s629_s20 + $0x178] sm:$0xff] }
  0x27   : > { %467 = vst [vmem:[%s657_s25 + $0xb8] sm:$0xff] %v403_v46  ;;  %v345_v56 = vadd.f32 %v634_v1, %v274_v49  ;;  %v276_v57 = vmul.f32 %v624_v0, %v205_v45  ;;  %v404_v61 = vmax.f32 %v340_v50, 0.0  ;;  %v405_v62 = vmax.f32 %v341_v51, 0.0 }
  0x28   : > { %v406_v63 = vmax.f32 %v342_v52, 0.0  ;;  %v346_v2 = vadd.f32 %v634_v1, %v275_v53  ;;  %v407_v6 = vmax.f32 %v343_v54, 0.0  ;;  %v408_v7 = vmax.f32 %v344_v55, 0.0 }
  0x29   : > { %v409_v8 = vmax.f32 %v345_v56, 0.0  ;;  %v347_v9 = vadd.f32 %v634_v1, %v276_v57  ;;  %468 = vst [vmem:[%s657_s25 + $0xc0] sm:$0xff] %v404_v61  ;;  %469 = vst [vmem:[%s657_s25 + $0xc8] sm:$0xff] %v405_v62  ;;  %v277_v12 = vmul.f32 %v624_v0, %v206_v58  ;;  %v278_v13 = vmul.f32 %v624_v0, %v207_v59  ;;  %v223_v61 = vld [vmem:[%s629_s20 + $0x188] sm:$0xff]  ;;  %v224_v62 = vld [vmem:[%s629_s20 + $0x190] sm:$0xff] }
  0x2a   : > { %470 = vst [vmem:[%s657_s25 + $0xd0] sm:$0xff] %v406_v63  ;;  %v410_v11 = vmax.f32 %v346_v2, 0.0  ;;  %v279_v14 = vmul.f32 %v624_v0, %v208_v60  ;;  %471 = vst [vmem:[%s657_s25 + $0xd8] sm:$0xff] %v407_v6  ;;  %v280_v17 = vmul.f32 %v624_v0, %v209_v3  ;;  %v281_v18 = vmul.f32 %v624_v0, %v210_v4  ;;  %v222_v60 = vld [vmem:[%s629_s20 + $0x180] sm:$0xff] }
  0x2b   : > { %472 = vst [vmem:[%s657_s25 + $0xe0] sm:$0xff] %v408_v7  ;;  %473 = vst [vmem:[%s657_s25 + $0xe8] sm:$0xff] %v409_v8  ;;  %v411_v16 = vmax.f32 %v347_v9, 0.0  ;;  %v282_v19 = vmul.f32 %v624_v0, %v211_v5  ;;  %v348_v20 = vadd.f32 %v634_v1, %v277_v12  ;;  %v349_v21 = vadd.f32 %v634_v1, %v278_v13  ;;  %v225_v5 = vld [vmem:[%s629_s20 + $0x198] sm:$0xff]  ;;  %v226_v6 = vld [vmem:[%s629_s20 + $0x1a0] sm:$0xff] }
  0x2c   : > { %474 = vst [vmem:[%s657_s25 + $0xf0] sm:$0xff] %v410_v11  ;;  %v350_v22 = vadd.f32 %v634_v1, %v279_v14  ;;  %v283_v23 = vmul.f32 %v624_v0, %v212_v10  ;;  %v351_v24 = vadd.f32 %v634_v1, %v280_v17  ;;  %v352_v25 = vadd.f32 %v634_v1, %v281_v18  ;;  %v227_v7 = vld [vmem:[%s629_s20 + $0x1a8] sm:$0xff]  ;;  %v228_v12 = vld [vmem:[%s629_s20 + $0x1b0] sm:$0xff]  ;;  %v229_v17 = vld [vmem:[%s629_s20 + $0x1b8] sm:$0xff] }
  0x2d   : > { %475 = vst [vmem:[%s657_s25 + $0xf8] sm:$0xff] %v411_v16  ;;  %v353_v26 = vadd.f32 %v634_v1, %v282_v19  ;;  %v284_v27 = vmul.f32 %v624_v0, %v213_v15  ;;  %v412_v31 = vmax.f32 %v348_v20, 0.0  ;;  %v413_v32 = vmax.f32 %v349_v21, 0.0 }
  0x2e   : > { %v414_v33 = vmax.f32 %v350_v22, 0.0  ;;  %v354_v34 = vadd.f32 %v634_v1, %v283_v23  ;;  %v415_v38 = vmax.f32 %v351_v24, 0.0  ;;  %v416_v39 = vmax.f32 %v352_v25, 0.0 }
  0x2f   : > { %v417_v40 = vmax.f32 %v353_v26, 0.0  ;;  %v355_v41 = vadd.f32 %v634_v1, %v284_v27  ;;  %476 = vst [vmem:[%s657_s25 + $0x100] sm:$0xff] %v412_v31  ;;  %477 = vst [vmem:[%s657_s25 + $0x108] sm:$0xff] %v413_v32  ;;  %v285_v44 = vmul.f32 %v624_v0, %v214_v28  ;;  %v286_v45 = vmul.f32 %v624_v0, %v215_v29  ;;  %v231_v31 = vld [vmem:[%s629_s20 + $0x1c8] sm:$0xff]  ;;  %v232_v32 = vld [vmem:[%s629_s20 + $0x1d0] sm:$0xff] }
  0x30   : > { %478 = vst [vmem:[%s657_s25 + $0x110] sm:$0xff] %v414_v33  ;;  %v418_v43 = vmax.f32 %v354_v34, 0.0  ;;  %v287_v46 = vmul.f32 %v624_v0, %v216_v30  ;;  %479 = vst [vmem:[%s657_s25 + $0x118] sm:$0xff] %v415_v38  ;;  %v288_v49 = vmul.f32 %v624_v0, %v217_v35  ;;  %v289_v50 = vmul.f32 %v624_v0, %v218_v36  ;;  %v230_v30 = vld [vmem:[%s629_s20 + $0x1c0] sm:$0xff] }
  0x31   : > { %480 = vst [vmem:[%s657_s25 + $0x120] sm:$0xff] %v416_v39  ;;  %481 = vst [vmem:[%s657_s25 + $0x128] sm:$0xff] %v417_v40  ;;  %v419_v48 = vmax.f32 %v355_v41, 0.0  ;;  %v290_v51 = vmul.f32 %v624_v0, %v219_v37  ;;  %v356_v52 = vadd.f32 %v634_v1, %v285_v44  ;;  %v357_v53 = vadd.f32 %v634_v1, %v286_v45  ;;  %v233_v37 = vld [vmem:[%s629_s20 + $0x1d8] sm:$0xff]  ;;  %v234_v38 = vld [vmem:[%s629_s20 + $0x1e0] sm:$0xff] }
  0x32   : > { %482 = vst [vmem:[%s657_s25 + $0x130] sm:$0xff] %v418_v43  ;;  %v358_v54 = vadd.f32 %v634_v1, %v287_v46  ;;  %v291_v55 = vmul.f32 %v624_v0, %v220_v42  ;;  %v359_v56 = vadd.f32 %v634_v1, %v288_v49  ;;  %v360_v57 = vadd.f32 %v634_v1, %v289_v50  ;;  %v235_v39 = vld [vmem:[%s629_s20 + $0x1e8] sm:$0xff]  ;;  %v236_v44 = vld [vmem:[%s629_s20 + $0x1f0] sm:$0xff]  ;;  %v237_v49 = vld [vmem:[%s629_s20 + $0x1f8] sm:$0xff] }
  0x33   : > { %483 = vst [vmem:[%s657_s25 + $0x138] sm:$0xff] %v419_v48  ;;  %v361_v58 = vadd.f32 %v634_v1, %v290_v51  ;;  %v292_v59 = vmul.f32 %v624_v0, %v221_v47  ;;  %v420_v63 = vmax.f32 %v356_v52, 0.0  ;;  %v421_v2 = vmax.f32 %v357_v53, 0.0 }
  0x34   : > { %v422_v3 = vmax.f32 %v358_v54, 0.0  ;;  %v362_v4 = vadd.f32 %v634_v1, %v291_v55  ;;  %v423_v8 = vmax.f32 %v359_v56, 0.0  ;;  %v424_v9 = vmax.f32 %v360_v57, 0.0 }
  0x35   : > { %v425_v10 = vmax.f32 %v361_v58, 0.0  ;;  %v363_v11 = vadd.f32 %v634_v1, %v292_v59  ;;  %484 = vst [vmem:[%s657_s25 + $0x140] sm:$0xff] %v420_v63  ;;  %485 = vst [vmem:[%s657_s25 + $0x148] sm:$0xff] %v421_v2  ;;  %v293_v14 = vmul.f32 %v624_v0, %v222_v60  ;;  %v294_v15 = vmul.f32 %v624_v0, %v223_v61 }
  0x36   : > { %486 = vst [vmem:[%s657_s25 + $0x150] sm:$0xff] %v422_v3  ;;  %v426_v13 = vmax.f32 %v362_v4, 0.0  ;;  %v295_v16 = vmul.f32 %v624_v0, %v224_v62  ;;  %487 = vst [vmem:[%s657_s25 + $0x158] sm:$0xff] %v423_v8  ;;  %v296_v19 = vmul.f32 %v624_v0, %v225_v5  ;;  %v297_v20 = vmul.f32 %v624_v0, %v226_v6 }
  0x37   : > { %488 = vst [vmem:[%s657_s25 + $0x160] sm:$0xff] %v424_v9  ;;  %489 = vst [vmem:[%s657_s25 + $0x168] sm:$0xff] %v425_v10  ;;  %v427_v18 = vmax.f32 %v363_v11, 0.0  ;;  %v298_v21 = vmul.f32 %v624_v0, %v227_v7  ;;  %v364_v22 = vadd.f32 %v634_v1, %v293_v14  ;;  %v365_v23 = vadd.f32 %v634_v1, %v294_v15 }
  0x38   : > { %490 = vst [vmem:[%s657_s25 + $0x170] sm:$0xff] %v426_v13  ;;  %v366_v24 = vadd.f32 %v634_v1, %v295_v16  ;;  %v299_v25 = vmul.f32 %v624_v0, %v228_v12  ;;  %v367_v26 = vadd.f32 %v634_v1, %v296_v19  ;;  %v368_v27 = vadd.f32 %v634_v1, %v297_v20 }
  0x39   : > { %491 = vst [vmem:[%s657_s25 + $0x178] sm:$0xff] %v427_v18  ;;  %v369_v28 = vadd.f32 %v634_v1, %v298_v21  ;;  %v300_v29 = vmul.f32 %v624_v0, %v229_v17  ;;  %v428_v33 = vmax.f32 %v364_v22, 0.0  ;;  %v429_v34 = vmax.f32 %v365_v23, 0.0 }
  0x3a   : > { %v430_v35 = vmax.f32 %v366_v24, 0.0  ;;  %v370_v36 = vadd.f32 %v634_v1, %v299_v25  ;;  %v431_v40 = vmax.f32 %v367_v26, 0.0  ;;  %v432_v41 = vmax.f32 %v368_v27, 0.0 }
  0x3b   : > { %v433_v42 = vmax.f32 %v369_v28, 0.0  ;;  %v371_v43 = vadd.f32 %v634_v1, %v300_v29  ;;  %492 = vst [vmem:[%s657_s25 + $0x180] sm:$0xff] %v428_v33  ;;  %493 = vst [vmem:[%s657_s25 + $0x188] sm:$0xff] %v429_v34  ;;  %v301_v46 = vmul.f32 %v624_v0, %v230_v30  ;;  %v302_v47 = vmul.f32 %v624_v0, %v231_v31 }
  0x3c   : > { %494 = vst [vmem:[%s657_s25 + $0x190] sm:$0xff] %v430_v35  ;;  %v434_v45 = vmax.f32 %v370_v36, 0.0  ;;  %v303_v48 = vmul.f32 %v624_v0, %v232_v32  ;;  %495 = vst [vmem:[%s657_s25 + $0x198] sm:$0xff] %v431_v40  ;;  %v304_v51 = vmul.f32 %v624_v0, %v233_v37  ;;  %v305_v52 = vmul.f32 %v624_v0, %v234_v38 }
  0x3d   : > { %496 = vst [vmem:[%s657_s25 + $0x1a0] sm:$0xff] %v432_v41  ;;  %497 = vst [vmem:[%s657_s25 + $0x1a8] sm:$0xff] %v433_v42  ;;  %v435_v50 = vmax.f32 %v371_v43, 0.0  ;;  %v306_v53 = vmul.f32 %v624_v0, %v235_v39  ;;  %v372_v54 = vadd.f32 %v634_v1, %v301_v46  ;;  %v373_v55 = vadd.f32 %v634_v1, %v302_v47 }
  0x3e   : > { %498 = vst [vmem:[%s657_s25 + $0x1b0] sm:$0xff] %v434_v45  ;;  %v374_v56 = vadd.f32 %v634_v1, %v303_v48  ;;  %v307_v57 = vmul.f32 %v624_v0, %v236_v44  ;;  %v375_v58 = vadd.f32 %v634_v1, %v304_v51  ;;  %v376_v59 = vadd.f32 %v634_v1, %v305_v52 }
  0x3f   : > { %499 = vst [vmem:[%s657_s25 + $0x1b8] sm:$0xff] %v435_v50  ;;  %v377_v60 = vadd.f32 %v634_v1, %v306_v53  ;;  %v308_v61 = vmul.f32 %v624_v0, %v237_v49  ;;  %v436_v62 = vmax.f32 %v372_v54, 0.0  ;;  %v437_v63 = vmax.f32 %v373_v55, 0.0 }
  0x40   : > { %v438_v2 = vmax.f32 %v374_v56, 0.0  ;;  %v378_v3 = vadd.f32 %v634_v1, %v307_v57  ;;  %v439_v4 = vmax.f32 %v375_v58, 0.0  ;;  %v440_v5 = vmax.f32 %v376_v59, 0.0 }
  0x41   : > { %v441_v6 = vmax.f32 %v377_v60, 0.0  ;;  %v379_v7 = vadd.f32 %v634_v1, %v308_v61  ;;  %500 = vst [vmem:[%s657_s25 + $0x1c0] sm:$0xff] %v436_v62  ;;  %501 = vst [vmem:[%s657_s25 + $0x1c8] sm:$0xff] %v437_v63 }
  0x42   : > { %502 = vst [vmem:[%s657_s25 + $0x1d0] sm:$0xff] %v438_v2  ;;  %v442_v8 = vmax.f32 %v378_v3, 0.0  ;;  %503 = vst [vmem:[%s657_s25 + $0x1d8] sm:$0xff] %v439_v4 }
  0x43   : > { %504 = vst [vmem:[%s657_s25 + $0x1e0] sm:$0xff] %v440_v5  ;;  %505 = vst [vmem:[%s657_s25 + $0x1e8] sm:$0xff] %v441_v6  ;;  %v443_v0 = vmax.f32 %v379_v7, 0.0 }
  0x44   : > { %506 = vst [vmem:[%s657_s25 + $0x1f0] sm:$0xff] %v442_v8 }
  0x45   : > { %507 = vst [vmem:[%s657_s25 + $0x1f8] sm:$0xff] %v443_v0 }
  0x46 PF: > { %s13_s12 = sadd.s32 1, %s591_s12  }
  0x47   : > { %p10_p4 = scmp.ge.s32.totalorder %s13_s12, 4  }
  0x49   :  { %12 = sbr.rel (!%p10_p4) target bundleno = 1 (0x1), region = 62 }

// kernel: _lambda_.2
= control target key start
LH: loop header
LB: loop body
LE: loop exit
PB: predicated region body
PF: predicated region fallthrough
CT: control target
= control target key end

     0   :  { %s1488_s15 = smov 0   ;;  %s1836_s0 = inlined_call_operand.vmem [shape: bf16[1024,128], index: 0, kind: input, shape index: {}]   ;;  %s1837_s1 = inlined_call_operand.vmem [shape: bf16[128,128], index: 1, kind: input, shape index: {}]   ;;  %s1838_s2 = inlined_call_operand.vmem [shape: f32[1024,128], index: 2, kind: output, shape index: {0}]   ;;  %s1839_s3 = inlined_call_operand.vmem [shape: f32[2,8,128], index: 3, kind: output, shape index: {1}]   ;;  %s1840_s4 = inlined_call_operand.vmem [shape: f32[2,8,128], index: 4, kind: output, shape index: {2}]  }
   0x1 LB: > { %s1494_s16 = sadd.s32 4294967295, %s1461_s15   ;;  %p1222_p0 = scmp.ge.s32.totalorder %s1461_s15, 1  ;;  %s1461_s15 = sphi %s1488_s15, %s15_s15  }
   0x2   : > { %p168_p1 = scmp.lt.s32.totalorder %s1461_s15, 3 }
   0x4   : > { %p169_p2 = pnand %p1222_p0, %p168_p1 }
   0x5   : > { %v1415_v0 = vld [vmem:[%s1837_s1] sm:$0xff] (!%p169_p2)   ;;  %s1223_s19 = sshll.u32 (!%p169_p2), %s1494_s16, 6  ;;  %v1416_v1 = vld [vmem:[%s1837_s1 + $0x8] sm:$0xff] (!%p169_p2)   ;;  %v1417_v2 = vld [vmem:[%s1837_s1 + $0x10] sm:$0xff] (!%p169_p2)   ;;  %p214_p4 = scmp.lt.s32.totalorder (!%p169_p2), %s1494_s16, 1 }
   0x6   : > { %172 = sbr.rel (%p169_p2) target bundleno = 394 (0x18a), region = 28  ;;  %p203_p3 = scmp.lt.s32.totalorder (!%p169_p2), %s1223_s19, 127  ;;  %1311 = vmatprep.subr.bf16.mxu0 (!%p169_p2), %v1415_v0  ;;  %1391 = vmatprep.subr.bf16.mxu1 (!%p169_p2), %v1415_v0  ;;  %v1418_v3 = vld [vmem:[%s1837_s1 + $0x18] sm:$0xff] (!%p169_p2)   ;;  %v1419_v5 = vld [vmem:[%s1837_s1 + $0x20] sm:$0xff] (!%p169_p2)   ;;  %v1420_v6 = vld [vmem:[%s1837_s1 + $0x28] sm:$0xff] (!%p169_p2)  }
   0x7   : > { %1312 = vmatpush3.bf16.msra.mxu0 (!%p169_p2), %v1415_v0  ;;  %1399 = vmatpush3.bf16.msra.mxu1 (!%p169_p2), %v1415_v0  ;;  %v1421_v7 = vld [vmem:[%s1837_s1 + $0x30] sm:$0xff] (!%p169_p2)   ;;  %v1422_v8 = vld [vmem:[%s1837_s1 + $0x38] sm:$0xff] (!%p169_p2)  }
   0x8   : > { %1313 = vmatprep.subr.bf16.mxu0 (!%p169_p2), %v1416_v1  ;;  %1392 = vmatprep.subr.bf16.mxu1 (!%p169_p2), %v1416_v1 }
   0xb   : > { %1314 = vmatpush3.bf16.msra.mxu0 (!%p169_p2), %v1416_v1  ;;  %1400 = vmatpush3.bf16.msra.mxu1 (!%p169_p2), %v1416_v1 }
   0xc   : > { %1315 = vmatprep.subr.bf16.mxu0 (!%p169_p2), %v1417_v2  ;;  %1393 = vmatprep.subr.bf16.mxu1 (!%p169_p2), %v1417_v2 }
   0xd   : > { %s1842_s19 = smov (!%p203_p3, %s1223_s19), 127  ;;  %s1844_s16 = smov (!%p214_p4, %s1494_s16), 1 }
   0xe   : > { %s1224_s24 = sshll.u32 %s1842_s19, 2  ;;  %s1226_s12 = sshll.u32 %s1842_s19, 3 }
   0xf   : > { %s1514_s27 = scalar_lea.vmem %s1836_s0, %s1224_s24  ;;  %1316 = vmatpush3.bf16.msra.mxu0 %v1417_v2  ;;  %1401 = vmatpush3.bf16.msra.mxu1 %v1417_v2  ;;  %s1567_s17 = scalar_lea.vmem %s1838_s2, %s1226_s12 }
  0x10   : > { %v1423_v4 = vld [vmem:[%s1514_s27] sm:$0xff]   ;;  %1317 = vmatprep.subr.bf16.mxu0 %v1418_v3  ;;  %1394 = vmatprep.subr.bf16.mxu1 %v1418_v3  ;;  %v1424_v10 = vld [vmem:[%s1514_s27 + $0x8] sm:$0xff]   ;;  %v1425_v11 = vld [vmem:[%s1514_s27 + $0x10] sm:$0xff]   ;;  %s1227_s18 = sshll.u32 %s1844_s16, 3 }
  0x11   : > { %1327 = vmatprep.mubr.bf16.mxu0 %v1423_v4  ;;  %v1439_v9 = vld [vmem:[%s1514_s27 + $0x80] sm:$0xff]   ;;  %v1440_v12 = vld [vmem:[%s1514_s27 + $0x88] sm:$0xff]   ;;  %v1441_v13 = vld [vmem:[%s1514_s27 + $0x90] sm:$0xff]   ;;  %s217_s21 = scalar_lea.vmem %s1839_s3, %s1227_s18  ;;  %s221_s24 = scalar_lea.vmem %s1840_s4, %s1227_s18 }
  0x12   : > { %1359 = vmatprep.mubr.bf16.mxu1 %v1439_v9  ;;  %v1426_v14 = vld [vmem:[%s1514_s27 + $0x18] sm:$0xff]   ;;  %v1427_v15 = vld [vmem:[%s1514_s27 + $0x20] sm:$0xff]   ;;  %v1428_v18 = vld [vmem:[%s1514_s27 + $0x28] sm:$0xff]  }
  0x13   : > { %1318 = vmatpush3.bf16.msra.mxu0 %v1418_v3  ;;  %1402 = vmatpush3.bf16.msra.mxu1 %v1418_v3  ;;  %v1442_v16 = vld [vmem:[%s1514_s27 + $0x98] sm:$0xff]   ;;  %v1443_v17 = vld [vmem:[%s1514_s27 + $0xa0] sm:$0xff]   ;;  %v1444_v19 = vld [vmem:[%s1514_s27 + $0xa8] sm:$0xff]  }
  0x14   : > { %1319 = vmatprep.subr.bf16.mxu0 %v1419_v5  ;;  %1395 = vmatprep.subr.bf16.mxu1 %v1419_v5  ;;  %v1429_v20 = vld [vmem:[%s1514_s27 + $0x30] sm:$0xff]   ;;  %v1430_v22 = vld [vmem:[%s1514_s27 + $0x38] sm:$0xff]   ;;  %v1431_v24 = vld [vmem:[%s1514_s27 + $0x40] sm:$0xff]  }
  0x15   : > { %v1445_v21 = vld [vmem:[%s1514_s27 + $0xb0] sm:$0xff]   ;;  %v1446_v23 = vld [vmem:[%s1514_s27 + $0xb8] sm:$0xff]   ;;  %v1447_v25 = vld [vmem:[%s1514_s27 + $0xc0] sm:$0xff]  }
  0x16   : > { %v1432_v26 = vld [vmem:[%s1514_s27 + $0x48] sm:$0xff]   ;;  %v1433_v28 = vld [vmem:[%s1514_s27 + $0x50] sm:$0xff]   ;;  %v1434_v30 = vld [vmem:[%s1514_s27 + $0x58] sm:$0xff]  }
  0x17   : > { %1320 = vmatpush3.bf16.msra.mxu0 %v1419_v5  ;;  %1403 = vmatpush3.bf16.msra.mxu1 %v1419_v5  ;;  %v1448_v27 = vld [vmem:[%s1514_s27 + $0xc8] sm:$0xff]   ;;  %v1449_v29 = vld [vmem:[%s1514_s27 + $0xd0] sm:$0xff]   ;;  %v1450_v31 = vld [vmem:[%s1514_s27 + $0xd8] sm:$0xff]  }
  0x18   : > { %1321 = vmatprep.subr.bf16.mxu0 %v1420_v6  ;;  %1396 = vmatprep.subr.bf16.mxu1 %v1420_v6  ;;  %v1435_v32 = vld [vmem:[%s1514_s27 + $0x60] sm:$0xff]   ;;  %v1436_v34 = vld [vmem:[%s1514_s27 + $0x68] sm:$0xff]   ;;  %v1437_v36 = vld [vmem:[%s1514_s27 + $0x70] sm:$0xff]  }
  0x19   : > { %v1451_v33 = vld [vmem:[%s1514_s27 + $0xe0] sm:$0xff]   ;;  %v1452_v35 = vld [vmem:[%s1514_s27 + $0xe8] sm:$0xff]   ;;  %v1453_v37 = vld [vmem:[%s1514_s27 + $0xf0] sm:$0xff]  }
  0x1a   : > { %v1438_v38 = vld [vmem:[%s1514_s27 + $0x78] sm:$0xff]  }
  0x1b   : > { %1322 = vmatpush3.bf16.msra.mxu0 %v1420_v6  ;;  %1404 = vmatpush3.bf16.msra.mxu1 %v1420_v6  ;;  %v1454_v39 = vld [vmem:[%s1514_s27 + $0xf8] sm:$0xff]  }
  0x1c   : > { %1323 = vmatprep.subr.bf16.mxu0 %v1421_v7  ;;  %1397 = vmatprep.subr.bf16.mxu1 %v1421_v7 }
  0x1f   : > { %1324 = vmatpush3.bf16.msra.mxu0 %v1421_v7  ;;  %1405 = vmatpush3.bf16.msra.mxu1 %v1421_v7 }
  0x20   : > { %1325 = vmatprep.subr.bf16.mxu0 %v1422_v8  ;;  %1398 = vmatprep.subr.bf16.mxu1 %v1422_v8 }
  0x23   : > { %1326 = vmatpush3.bf16.msra.mxu0 %v1422_v8  ;;  %1406 = vmatpush3.bf16.msra.mxu1 %v1422_v8 }
  0x26   : > { %1328 = vmatmul.mubr.bf16.vlgmr.msra.gmra.mrb[0].mxu0 %v1424_v10  ;;  %1360 = vmatmul.mubr.bf16.vlgmr.msra.gmra.mrb[0].mxu1 %v1440_v12 }
  0x27   : > { %1331 = vmatprep.mubr.bf16.mxu0 %v1425_v11  ;;  %1363 = vmatprep.mubr.bf16.mxu1 %v1441_v13 }
  0x2e   : > { %1332 = vmatmul.mubr.bf16.gmra.mrb[4].mxu0 %v1426_v14  ;;  %1364 = vmatmul.mubr.bf16.gmra.mrb[4].mxu1 %v1442_v16 }
  0x2f   : > { %1335 = vmatprep.mubr.bf16.mxu0 %v1427_v15  ;;  %1367 = vmatprep.mubr.bf16.mxu1 %v1443_v17 }
  0x36   : > { %1336 = vmatmul.mubr.bf16.gmra.mrb[8].mxu0 %v1428_v18  ;;  %1368 = vmatmul.mubr.bf16.gmra.mrb[8].mxu1 %v1444_v19 }
  0x37   : > { %1339 = vmatprep.mubr.bf16.mxu0 %v1429_v20  ;;  %1371 = vmatprep.mubr.bf16.mxu1 %v1445_v21 }
  0x3e   : > { %1340 = vmatmul.mubr.bf16.gmra.mrb[12].mxu0 %v1430_v22  ;;  %1372 = vmatmul.mubr.bf16.gmra.mrb[12].mxu1 %v1446_v23 }
  0x3f   : > { %1343 = vmatprep.mubr.bf16.mxu0 %v1431_v24  ;;  %1375 = vmatprep.mubr.bf16.mxu1 %v1447_v25 }
  0x46   : > { %1344 = vmatmul.mubr.bf16.gmra.mrb[16].mxu0 %v1432_v26  ;;  %1376 = vmatmul.mubr.bf16.gmra.mrb[16].mxu1 %v1448_v27 }
  0x47   : > { %1347 = vmatprep.mubr.bf16.mxu0 %v1433_v28  ;;  %1379 = vmatprep.mubr.bf16.mxu1 %v1449_v29 }
  0x4e   : > { %1348 = vmatmul.mubr.bf16.gmra.mrb[20].mxu0 %v1434_v30  ;;  %1380 = vmatmul.mubr.bf16.gmra.mrb[20].mxu1 %v1450_v31 }
  0x4f   : > { %1351 = vmatprep.mubr.bf16.mxu0 %v1435_v32  ;;  %1383 = vmatprep.mubr.bf16.mxu1 %v1451_v33 }
  0x56   : > { %1352 = vmatmul.mubr.bf16.gmra.mrb[24].mxu0 %v1436_v34  ;;  %1384 = vmatmul.mubr.bf16.gmra.mrb[24].mxu1 %v1452_v35 }
  0x57   : > { %1355 = vmatprep.mubr.bf16.mxu0 %v1437_v36  ;;  %1387 = vmatprep.mubr.bf16.mxu1 %v1453_v37 }
  0x5e   : > { %1356 = vmatmul.mubr.bf16.gmra.mrb[28].mxu0 %v1438_v38  ;;  %1388 = vmatmul.mubr.bf16.gmra.mrb[28].mxu1 %v1454_v39 }
  0xf9   : > { %v1329_v40 = vpop.f32.mrb[0].mxu0  ;;  %v1569_v41 = vpop.f32.mrb[0].mxu1 }
  0xfa   : > { %834 = vst [vmem:[%s1567_s17 + $0x10] sm:$0xff] %v1329_v40  ;;  %v577_v42 = vpop.f32.mrb[1].mxu0  ;;  %866 = vst [vmem:[%s1567_s17 + $0x110] sm:$0xff] %v1569_v41  ;;  %v1574_v43 = vpop.f32.mrb[1].mxu1  ;;  %v967_v51 = vmul.f32 %v1329_v40, %v1329_v40 }
  0xfb   : > { %832 = vst [vmem:[%s1567_s17] sm:$0xff] %v577_v42  ;;  %v1330_v44 = vpop.f32.mrb[2].mxu0  ;;  %864 = vst [vmem:[%s1567_s17 + $0x100] sm:$0xff] %v1574_v43  ;;  %v1579_v45 = vpop.f32.mrb[2].mxu1  ;;  %v965_v48 = vmul.f32 %v577_v42, %v577_v42 }
  0xfc   : > { %835 = vst [vmem:[%s1567_s17 + $0x18] sm:$0xff] %v1330_v44  ;;  %v580_v46 = vpop.f32.mrb[3].mxu0  ;;  %867 = vst [vmem:[%s1567_s17 + $0x118] sm:$0xff] %v1579_v45  ;;  %v1584_v47 = vpop.f32.mrb[3].mxu1  ;;  %v968_v54 = vmul.f32 %v1330_v44, %v1330_v44 }
  0xfd   : > { %833 = vst [vmem:[%s1567_s17 + $0x8] sm:$0xff] %v580_v46  ;;  %v896_v49 = vadd.f32 %v580_v46, %v577_v42  ;;  %v966_v50 = vmul.f32 %v580_v46, %v580_v46  ;;  %865 = vst [vmem:[%s1567_s17 + $0x108] sm:$0xff] %v1584_v47 }
  0xff   : > { %v897_v52 = vadd.f32 %v1329_v40, %v896_v49  ;;  %v1029_v53 = vadd.f32 %v966_v50, %v965_v48 }
 0x101   : > { %v1030_v55 = vadd.f32 %v1029_v53, %v967_v51  ;;  %v1333_v56 = vpop.f32.mrb[4].mxu0  ;;  %v898_v57 = vadd.f32 %v1330_v44, %v897_v52  ;;  %v1589_v58 = vpop.f32.mrb[4].mxu1 }
 0x102   : > { %838 = vst [vmem:[%s1567_s17 + $0x30] sm:$0xff] %v1333_v56  ;;  %v593_v59 = vpop.f32.mrb[5].mxu0  ;;  %870 = vst [vmem:[%s1567_s17 + $0x130] sm:$0xff] %v1589_v58  ;;  %v1594_v60 = vpop.f32.mrb[5].mxu1  ;;  %v971_v7 = vmul.f32 %v1333_v56, %v1333_v56 }
 0x103   : > { %836 = vst [vmem:[%s1567_s17 + $0x20] sm:$0xff] %v593_v59  ;;  %v899_v61 = vadd.f32 %v898_v57, %v593_v59  ;;  %v969_v62 = vmul.f32 %v593_v59, %v593_v59  ;;  %v1031_v63 = vadd.f32 %v1030_v55, %v968_v54  ;;  %v1334_v0 = vpop.f32.mrb[6].mxu0  ;;  %868 = vst [vmem:[%s1567_s17 + $0x120] sm:$0xff] %v1594_v60  ;;  %v1599_v1 = vpop.f32.mrb[6].mxu1 }
 0x104   : > { %839 = vst [vmem:[%s1567_s17 + $0x38] sm:$0xff] %v1334_v0  ;;  %v596_v2 = vpop.f32.mrb[7].mxu0  ;;  %871 = vst [vmem:[%s1567_s17 + $0x138] sm:$0xff] %v1599_v1  ;;  %v1604_v3 = vpop.f32.mrb[7].mxu1  ;;  %v972_v10 = vmul.f32 %v1334_v0, %v1334_v0 }
 0x105   : > { %v1032_v4 = vadd.f32 %v1031_v63, %v969_v62  ;;  %837 = vst [vmem:[%s1567_s17 + $0x28] sm:$0xff] %v596_v2  ;;  %v900_v5 = vadd.f32 %v899_v61, %v596_v2  ;;  %v970_v6 = vmul.f32 %v596_v2, %v596_v2  ;;  %869 = vst [vmem:[%s1567_s17 + $0x128] sm:$0xff] %v1604_v3 }
 0x107   : > { %v901_v8 = vadd.f32 %v1333_v56, %v900_v5  ;;  %v1033_v9 = vadd.f32 %v1032_v4, %v970_v6 }
 0x109   : > { %v1034_v11 = vadd.f32 %v1033_v9, %v971_v7  ;;  %v1337_v12 = vpop.f32.mrb[8].mxu0  ;;  %v902_v13 = vadd.f32 %v1334_v0, %v901_v8  ;;  %v1609_v14 = vpop.f32.mrb[8].mxu1 }
 0x10a   : > { %842 = vst [vmem:[%s1567_s17 + $0x50] sm:$0xff] %v1337_v12  ;;  %v609_v15 = vpop.f32.mrb[9].mxu0  ;;  %874 = vst [vmem:[%s1567_s17 + $0x150] sm:$0xff] %v1609_v14  ;;  %v1614_v16 = vpop.f32.mrb[9].mxu1  ;;  %v975_v27 = vmul.f32 %v1337_v12, %v1337_v12 }
 0x10b   : > { %840 = vst [vmem:[%s1567_s17 + $0x40] sm:$0xff] %v609_v15  ;;  %v903_v17 = vadd.f32 %v902_v13, %v609_v15  ;;  %v973_v18 = vmul.f32 %v609_v15, %v609_v15  ;;  %v1035_v19 = vadd.f32 %v1034_v11, %v972_v10  ;;  %v1338_v20 = vpop.f32.mrb[10].mxu0  ;;  %872 = vst [vmem:[%s1567_s17 + $0x140] sm:$0xff] %v1614_v16  ;;  %v1619_v21 = vpop.f32.mrb[10].mxu1 }
 0x10c   : > { %843 = vst [vmem:[%s1567_s17 + $0x58] sm:$0xff] %v1338_v20  ;;  %v612_v22 = vpop.f32.mrb[11].mxu0  ;;  %875 = vst [vmem:[%s1567_s17 + $0x158] sm:$0xff] %v1619_v21  ;;  %v1624_v23 = vpop.f32.mrb[11].mxu1  ;;  %v976_v30 = vmul.f32 %v1338_v20, %v1338_v20 }
 0x10d   : > { %v1036_v24 = vadd.f32 %v1035_v19, %v973_v18  ;;  %841 = vst [vmem:[%s1567_s17 + $0x48] sm:$0xff] %v612_v22  ;;  %v904_v25 = vadd.f32 %v903_v17, %v612_v22  ;;  %v974_v26 = vmul.f32 %v612_v22, %v612_v22  ;;  %873 = vst [vmem:[%s1567_s17 + $0x148] sm:$0xff] %v1624_v23 }
 0x10f   : > { %v905_v28 = vadd.f32 %v1337_v12, %v904_v25  ;;  %v1037_v29 = vadd.f32 %v1036_v24, %v974_v26 }
 0x111   : > { %v1038_v31 = vadd.f32 %v1037_v29, %v975_v27  ;;  %v1341_v32 = vpop.f32.mrb[12].mxu0  ;;  %v906_v33 = vadd.f32 %v1338_v20, %v905_v28  ;;  %v1629_v34 = vpop.f32.mrb[12].mxu1 }
 0x112   : > { %846 = vst [vmem:[%s1567_s17 + $0x70] sm:$0xff] %v1341_v32  ;;  %v625_v35 = vpop.f32.mrb[13].mxu0  ;;  %878 = vst [vmem:[%s1567_s17 + $0x170] sm:$0xff] %v1629_v34  ;;  %v1634_v36 = vpop.f32.mrb[13].mxu1  ;;  %v979_v51 = vmul.f32 %v1341_v32, %v1341_v32 }
 0x113   : > { %844 = vst [vmem:[%s1567_s17 + $0x60] sm:$0xff] %v625_v35  ;;  %v907_v37 = vadd.f32 %v906_v33, %v625_v35  ;;  %v977_v38 = vmul.f32 %v625_v35, %v625_v35  ;;  %v1039_v39 = vadd.f32 %v1038_v31, %v976_v30  ;;  %v1342_v40 = vpop.f32.mrb[14].mxu0  ;;  %876 = vst [vmem:[%s1567_s17 + $0x160] sm:$0xff] %v1634_v36  ;;  %v1639_v42 = vpop.f32.mrb[14].mxu1 }
 0x114   : > { %847 = vst [vmem:[%s1567_s17 + $0x78] sm:$0xff] %v1342_v40  ;;  %v628_v44 = vpop.f32.mrb[15].mxu0  ;;  %879 = vst [vmem:[%s1567_s17 + $0x178] sm:$0xff] %v1639_v42  ;;  %v1644_v46 = vpop.f32.mrb[15].mxu1  ;;  %v980_v54 = vmul.f32 %v1342_v40, %v1342_v40 }
 0x115   : > { %v1040_v48 = vadd.f32 %v1039_v39, %v977_v38  ;;  %845 = vst [vmem:[%s1567_s17 + $0x68] sm:$0xff] %v628_v44  ;;  %v908_v49 = vadd.f32 %v907_v37, %v628_v44  ;;  %v978_v50 = vmul.f32 %v628_v44, %v628_v44  ;;  %877 = vst [vmem:[%s1567_s17 + $0x168] sm:$0xff] %v1644_v46 }
 0x117   : > { %v909_v52 = vadd.f32 %v1341_v32, %v908_v49  ;;  %v1041_v53 = vadd.f32 %v1040_v48, %v978_v50 }
 0x119   : > { %v1042_v55 = vadd.f32 %v1041_v53, %v979_v51  ;;  %v1345_v56 = vpop.f32.mrb[16].mxu0  ;;  %v910_v57 = vadd.f32 %v1342_v40, %v909_v52  ;;  %v1649_v59 = vpop.f32.mrb[16].mxu1 }
 0x11a   : > { %850 = vst [vmem:[%s1567_s17 + $0x90] sm:$0xff] %v1345_v56  ;;  %v641_v61 = vpop.f32.mrb[17].mxu0  ;;  %882 = vst [vmem:[%s1567_s17 + $0x190] sm:$0xff] %v1649_v59  ;;  %v1654_v62 = vpop.f32.mrb[17].mxu1  ;;  %v983_v11 = vmul.f32 %v1345_v56, %v1345_v56 }
 0x11b   : > { %848 = vst [vmem:[%s1567_s17 + $0x80] sm:$0xff] %v641_v61  ;;  %v911_v63 = vadd.f32 %v910_v57, %v641_v61  ;;  %v981_v0 = vmul.f32 %v641_v61, %v641_v61  ;;  %v1043_v2 = vadd.f32 %v1042_v55, %v980_v54  ;;  %v1346_v4 = vpop.f32.mrb[18].mxu0  ;;  %880 = vst [vmem:[%s1567_s17 + $0x180] sm:$0xff] %v1654_v62  ;;  %v1659_v5 = vpop.f32.mrb[18].mxu1 }
 0x11c   : > { %851 = vst [vmem:[%s1567_s17 + $0x98] sm:$0xff] %v1346_v4  ;;  %v644_v6 = vpop.f32.mrb[19].mxu0  ;;  %883 = vst [vmem:[%s1567_s17 + $0x198] sm:$0xff] %v1659_v5  ;;  %v1664_v7 = vpop.f32.mrb[19].mxu1  ;;  %v984_v15 = vmul.f32 %v1346_v4, %v1346_v4 }
 0x11d   : > { %v1044_v8 = vadd.f32 %v1043_v2, %v981_v0  ;;  %849 = vst [vmem:[%s1567_s17 + $0x88] sm:$0xff] %v644_v6  ;;  %v912_v9 = vadd.f32 %v911_v63, %v644_v6  ;;  %v982_v10 = vmul.f32 %v644_v6, %v644_v6  ;;  %881 = vst [vmem:[%s1567_s17 + $0x188] sm:$0xff] %v1664_v7 }
 0x11f   : > { %v913_v12 = vadd.f32 %v1345_v56, %v912_v9  ;;  %v1045_v13 = vadd.f32 %v1044_v8, %v982_v10 }
 0x121   : > { %v1046_v17 = vadd.f32 %v1045_v13, %v983_v11  ;;  %v1349_v18 = vpop.f32.mrb[20].mxu0  ;;  %v914_v19 = vadd.f32 %v1346_v4, %v913_v12  ;;  %v1669_v20 = vpop.f32.mrb[20].mxu1 }
 0x122   : > { %854 = vst [vmem:[%s1567_s17 + $0xb0] sm:$0xff] %v1349_v18  ;;  %v657_v22 = vpop.f32.mrb[21].mxu0  ;;  %886 = vst [vmem:[%s1567_s17 + $0x1b0] sm:$0xff] %v1669_v20  ;;  %v1674_v24 = vpop.f32.mrb[21].mxu1  ;;  %v987_v37 = vmul.f32 %v1349_v18, %v1349_v18 }
 0x123   : > { %852 = vst [vmem:[%s1567_s17 + $0xa0] sm:$0xff] %v657_v22  ;;  %v915_v25 = vadd.f32 %v914_v19, %v657_v22  ;;  %v985_v26 = vmul.f32 %v657_v22, %v657_v22  ;;  %v1047_v27 = vadd.f32 %v1046_v17, %v984_v15  ;;  %v1350_v28 = vpop.f32.mrb[22].mxu0  ;;  %884 = vst [vmem:[%s1567_s17 + $0x1a0] sm:$0xff] %v1674_v24  ;;  %v1679_v29 = vpop.f32.mrb[22].mxu1 }
 0x124   : > { %855 = vst [vmem:[%s1567_s17 + $0xb8] sm:$0xff] %v1350_v28  ;;  %v660_v30 = vpop.f32.mrb[23].mxu0  ;;  %887 = vst [vmem:[%s1567_s17 + $0x1b8] sm:$0xff] %v1679_v29  ;;  %v1684_v31 = vpop.f32.mrb[23].mxu1  ;;  %v988_v40 = vmul.f32 %v1350_v28, %v1350_v28 }
 0x125   : > { %v1048_v32 = vadd.f32 %v1047_v27, %v985_v26  ;;  %853 = vst [vmem:[%s1567_s17 + $0xa8] sm:$0xff] %v660_v30  ;;  %v916_v33 = vadd.f32 %v915_v25, %v660_v30  ;;  %v986_v35 = vmul.f32 %v660_v30, %v660_v30  ;;  %885 = vst [vmem:[%s1567_s17 + $0x1a8] sm:$0xff] %v1684_v31 }
 0x127   : > { %v917_v38 = vadd.f32 %v1349_v18, %v916_v33  ;;  %v1049_v39 = vadd.f32 %v1048_v32, %v986_v35 }
 0x129   : > { %v1050_v44 = vadd.f32 %v1049_v39, %v987_v37  ;;  %v1353_v48 = vpop.f32.mrb[24].mxu0  ;;  %v918_v49 = vadd.f32 %v1350_v28, %v917_v38  ;;  %v1689_v50 = vpop.f32.mrb[24].mxu1 }
 0x12a   : > { %858 = vst [vmem:[%s1567_s17 + $0xd0] sm:$0xff] %v1353_v48  ;;  %v673_v51 = vpop.f32.mrb[25].mxu0  ;;  %890 = vst [vmem:[%s1567_s17 + $0x1d0] sm:$0xff] %v1689_v50  ;;  %v1694_v52 = vpop.f32.mrb[25].mxu1  ;;  %v991_v6 = vmul.f32 %v1353_v48, %v1353_v48 }
 0x12b   : > { %856 = vst [vmem:[%s1567_s17 + $0xc0] sm:$0xff] %v673_v51  ;;  %v919_v53 = vadd.f32 %v918_v49, %v673_v51  ;;  %v989_v54 = vmul.f32 %v673_v51, %v673_v51  ;;  %v1051_v55 = vadd.f32 %v1050_v44, %v988_v40  ;;  %v1354_v56 = vpop.f32.mrb[26].mxu0  ;;  %888 = vst [vmem:[%s1567_s17 + $0x1c0] sm:$0xff] %v1694_v52  ;;  %v1699_v57 = vpop.f32.mrb[26].mxu1 }
 0x12c   : > { %859 = vst [vmem:[%s1567_s17 + $0xd8] sm:$0xff] %v1354_v56  ;;  %v676_v61 = vpop.f32.mrb[27].mxu0  ;;  %891 = vst [vmem:[%s1567_s17 + $0x1d8] sm:$0xff] %v1699_v57  ;;  %v1704_v63 = vpop.f32.mrb[27].mxu1  ;;  %v992_v10 = vmul.f32 %v1354_v56, %v1354_v56  ;;  %v997_v49 = vmul.f32 %v1574_v43, %v1574_v43 }
 0x12d   : > { %v1052_v0 = vadd.f32 %v1051_v55, %v989_v54  ;;  %857 = vst [vmem:[%s1567_s17 + $0xc8] sm:$0xff] %v676_v61  ;;  %v920_v2 = vadd.f32 %v919_v53, %v676_v61  ;;  %v990_v4 = vmul.f32 %v676_v61, %v676_v61  ;;  %889 = vst [vmem:[%s1567_s17 + $0x1c8] sm:$0xff] %v1704_v63 }
 0x12e   : > { %v999_v61 = vmul.f32 %v1569_v41, %v1569_v41 }
 0x12f   : > { %v921_v8 = vadd.f32 %v1353_v48, %v920_v2  ;;  %v1053_v9 = vadd.f32 %v1052_v0, %v990_v4  ;;  %v1000_v4 = vmul.f32 %v1579_v45, %v1579_v45 }
 0x131   : > { %v1054_v11 = vadd.f32 %v1053_v9, %v991_v6  ;;  %v1357_v12 = vpop.f32.mrb[28].mxu0  ;;  %v922_v13 = vadd.f32 %v1354_v56, %v921_v8  ;;  %v1709_v15 = vpop.f32.mrb[28].mxu1  ;;  %v998_v56 = vmul.f32 %v1584_v47, %v1584_v47 }
 0x132   : > { %862 = vst [vmem:[%s1567_s17 + $0xf0] sm:$0xff] %v1357_v12  ;;  %v689_v17 = vpop.f32.mrb[29].mxu0  ;;  %894 = vst [vmem:[%s1567_s17 + $0x1f0] sm:$0xff] %v1709_v15  ;;  %v1714_v18 = vpop.f32.mrb[29].mxu1  ;;  %v995_v37 = vmul.f32 %v1357_v12, %v1357_v12 }
 0x133   : > { %860 = vst [vmem:[%s1567_s17 + $0xe0] sm:$0xff] %v689_v17  ;;  %v923_v19 = vadd.f32 %v922_v13, %v689_v17  ;;  %v993_v22 = vmul.f32 %v689_v17, %v689_v17  ;;  %v1055_v25 = vadd.f32 %v1054_v11, %v992_v10  ;;  %v1358_v26 = vpop.f32.mrb[30].mxu0  ;;  %892 = vst [vmem:[%s1567_s17 + $0x1e0] sm:$0xff] %v1714_v18  ;;  %v1719_v27 = vpop.f32.mrb[30].mxu1 }
 0x134   : > { %863 = vst [vmem:[%s1567_s17 + $0xf8] sm:$0xff] %v1358_v26  ;;  %v692_v28 = vpop.f32.mrb[31].mxu0  ;;  %895 = vst [vmem:[%s1567_s17 + $0x1f8] sm:$0xff] %v1719_v27  ;;  %v1724_v30 = vpop.f32.mrb[31].mxu1  ;;  %v996_v40 = vmul.f32 %v1358_v26, %v1358_v26 }
 0x135   : > { %v1056_v32 = vadd.f32 %v1055_v25, %v993_v22  ;;  %861 = vst [vmem:[%s1567_s17 + $0xe8] sm:$0xff] %v692_v28  ;;  %v924_v33 = vadd.f32 %v923_v19, %v692_v28  ;;  %v994_v35 = vmul.f32 %v692_v28, %v692_v28  ;;  %893 = vst [vmem:[%s1567_s17 + $0x1e8] sm:$0xff] %v1724_v30 }
 0x137   : > { %v925_v38 = vadd.f32 %v1357_v12, %v924_v33  ;;  %v1057_v39 = vadd.f32 %v1056_v32, %v994_v35  ;;  %v1002_v12 = vmul.f32 %v1604_v3, %v1604_v3  ;;  %v1006_v32 = vmul.f32 %v1624_v23, %v1624_v23 }
 0x139   : > { %v1058_v44 = vadd.f32 %v1057_v39, %v995_v37  ;;  %v926_v48 = vadd.f32 %v1358_v26, %v925_v38 }
 0x13b   : > { %v927_v51 = vadd.f32 %v926_v48, %v1574_v43  ;;  %v1059_v53 = vadd.f32 %v1058_v44, %v996_v40  ;;  %v1001_v43 = vmul.f32 %v1594_v60, %v1594_v60  ;;  %v1010_v48 = vmul.f32 %v1644_v46, %v1644_v46 }
 0x13d   : > { %v1060_v54 = vadd.f32 %v1059_v53, %v997_v49  ;;  %v928_v55 = vadd.f32 %v927_v51, %v1584_v47 }
 0x13f   : > { %v929_v0 = vadd.f32 %v1569_v41, %v928_v55  ;;  %v1061_v2 = vadd.f32 %v1060_v54, %v998_v56  ;;  %v1003_v41 = vmul.f32 %v1589_v58, %v1589_v58 }
 0x141   : > { %v1062_v6 = vadd.f32 %v1061_v2, %v999_v61  ;;  %v930_v8 = vadd.f32 %v1579_v45, %v929_v0  ;;  %v1004_v45 = vmul.f32 %v1599_v1, %v1599_v1  ;;  %v1014_v0 = vmul.f32 %v1664_v7, %v1664_v7 }
 0x143   : > { %v931_v9 = vadd.f32 %v930_v8, %v1594_v60  ;;  %v1063_v10 = vadd.f32 %v1062_v6, %v1000_v4  ;;  %v1005_v60 = vmul.f32 %v1614_v16, %v1614_v16 }
 0x145   : > { %v1064_v11 = vadd.f32 %v1063_v10, %v1001_v43  ;;  %v932_v47 = vadd.f32 %v931_v9, %v1604_v3 }
 0x147   : > { %v933_v13 = vadd.f32 %v1589_v58, %v932_v47  ;;  %v1065_v17 = vadd.f32 %v1064_v11, %v1002_v12  ;;  %v1007_v58 = vmul.f32 %v1609_v14, %v1609_v14  ;;  %v1018_v11 = vmul.f32 %v1684_v31, %v1684_v31 }
 0x149   : > { %v1066_v19 = vadd.f32 %v1065_v17, %v1003_v41  ;;  %v934_v22 = vadd.f32 %v1599_v1, %v933_v13  ;;  %v1008_v1 = vmul.f32 %v1619_v21, %v1619_v21 }
 0x14b   : > { %v935_v25 = vadd.f32 %v934_v22, %v1614_v16  ;;  %v1067_v26 = vadd.f32 %v1066_v19, %v1004_v45  ;;  %v1009_v16 = vmul.f32 %v1634_v36, %v1634_v36  ;;  %v1022_v22 = vmul.f32 %v1704_v63, %v1704_v63 }
 0x14d   : > { %v1068_v28 = vadd.f32 %v1067_v26, %v1005_v60  ;;  %v936_v3 = vadd.f32 %v935_v25, %v1624_v23 }
 0x14f   : > { %v937_v33 = vadd.f32 %v1609_v14, %v936_v3  ;;  %v1069_v35 = vadd.f32 %v1068_v28, %v1006_v32  ;;  %v1011_v14 = vmul.f32 %v1629_v34, %v1629_v34  ;;  %v1025_v28 = vmul.f32 %v1714_v18, %v1714_v18 }
 0x151   : > { %v1070_v37 = vadd.f32 %v1069_v35, %v1007_v58  ;;  %v938_v38 = vadd.f32 %v1619_v21, %v937_v33  ;;  %v1012_v21 = vmul.f32 %v1639_v42, %v1639_v42  ;;  %v1027_v33 = vmul.f32 %v1709_v15, %v1709_v15 }
 0x153   : > { %v939_v39 = vadd.f32 %v938_v38, %v1634_v36  ;;  %v1071_v40 = vadd.f32 %v1070_v37, %v1008_v1  ;;  %v1013_v36 = vmul.f32 %v1654_v62, %v1654_v62 }
 0x155   : > { %v1072_v44 = vadd.f32 %v1071_v40, %v1009_v16  ;;  %v940_v23 = vadd.f32 %v939_v39, %v1644_v46 }
 0x157   : > { %v941_v49 = vadd.f32 %v1629_v34, %v940_v23  ;;  %v1073_v51 = vadd.f32 %v1072_v44, %v1010_v48  ;;  %v1015_v34 = vmul.f32 %v1649_v59, %v1649_v59 }
 0x159   : > { %v1074_v53 = vadd.f32 %v1073_v51, %v1011_v14  ;;  %v942_v54 = vadd.f32 %v1639_v42, %v941_v49  ;;  %v1016_v42 = vmul.f32 %v1659_v5, %v1659_v5 }
 0x15b   : > { %v943_v55 = vadd.f32 %v942_v54, %v1654_v62  ;;  %v1075_v56 = vadd.f32 %v1074_v53, %v1012_v21  ;;  %v1017_v62 = vmul.f32 %v1674_v24, %v1674_v24 }
 0x15d   : > { %v1076_v61 = vadd.f32 %v1075_v56, %v1013_v36  ;;  %v944_v46 = vadd.f32 %v943_v55, %v1664_v7 }
 0x15f   : > { %v945_v2 = vadd.f32 %v1649_v59, %v944_v46  ;;  %v1077_v4 = vadd.f32 %v1076_v61, %v1014_v0  ;;  %v1019_v59 = vmul.f32 %v1669_v20, %v1669_v20 }
 0x161   : > { %v1078_v6 = vadd.f32 %v1077_v4, %v1015_v34  ;;  %v946_v8 = vadd.f32 %v1659_v5, %v945_v2  ;;  %v1020_v5 = vmul.f32 %v1679_v29, %v1679_v29 }
 0x163   : > { %v947_v43 = vadd.f32 %v946_v8, %v1674_v24  ;;  %v1079_v9 = vadd.f32 %v1078_v6, %v1016_v42  ;;  %v1021_v24 = vmul.f32 %v1694_v52, %v1694_v52 }
 0x165   : > { %v1080_v10 = vadd.f32 %v1079_v9, %v1017_v62  ;;  %v948_v7 = vadd.f32 %v947_v43, %v1684_v31 }
 0x167   : > { %v949_v47 = vadd.f32 %v1669_v20, %v948_v7  ;;  %v1081_v12 = vadd.f32 %v1080_v10, %v1018_v11  ;;  %v1023_v20 = vmul.f32 %v1689_v50, %v1689_v50 }
 0x169   : > { %v1082_v41 = vadd.f32 %v1081_v12, %v1019_v59  ;;  %v950_v13 = vadd.f32 %v1679_v29, %v949_v47  ;;  %v1024_v29 = vmul.f32 %v1699_v57, %v1699_v57 }
 0x16b   : > { %v951_v17 = vadd.f32 %v950_v13, %v1694_v52  ;;  %v1083_v45 = vadd.f32 %v1082_v41, %v1020_v5 }
 0x16d   : > { %v1084_v19 = vadd.f32 %v1083_v45, %v1021_v24  ;;  %v952_v31 = vadd.f32 %v951_v17, %v1704_v63 }
 0x16f   : > { %v953_v60 = vadd.f32 %v1689_v50, %v952_v31  ;;  %v1085_v25 = vadd.f32 %v1084_v19, %v1022_v22  ;;  %v1026_v50 = vmul.f32 %v1724_v30, %v1724_v30 }
 0x171   : > { %v1086_v26 = vadd.f32 %v1085_v25, %v1023_v20  ;;  %v954_v52 = vadd.f32 %v1699_v57, %v953_v60  ;;  %v1028_v57 = vmul.f32 %v1719_v27, %v1719_v27 }
 0x173   : > { %v955_v3 = vadd.f32 %v954_v52, %v1714_v18  ;;  %v1087_v63 = vadd.f32 %v1086_v26, %v1024_v29 }
 0x175   : > { %v1088_v32 = vadd.f32 %v1087_v63, %v1025_v28  ;;  %v956_v58 = vadd.f32 %v955_v3, %v1724_v30 }
 0x177   : > { %v957_v35 = vadd.f32 %v1709_v15, %v956_v58  ;;  %v1089_v1 = vadd.f32 %v1088_v32, %v1026_v50 }
 0x179   : > { %v958_v37 = vadd.f32 %v1719_v27, %v957_v35  ;;  %v1090_v18 = vadd.f32 %v1089_v1, %v1027_v33 }
 0x17b   : > { %v959_v38 = vrot.slane %v958_v37, 4  ;;  %v1091_v16 = vadd.f32 %v1090_v18, %v1028_v57 }
 0x17d   : > { %v960_v39 = vadd.f32 %v959_v38, %v958_v37  ;;  %v1092_v40 = vrot.slane %v1091_v16, 4 }
 0x17f   : > { %v961_v44 = vrot.slane %v960_v39, 2  ;;  %v1093_v30 = vadd.f32 %v1092_v40, %v1091_v16 }
 0x181   : > { %v962_v23 = vadd.f32 %v961_v44, %v960_v39  ;;  %v1094_v48 = vrot.slane %v1093_v30, 2 }
 0x183   : > { %v963_v14 = vrot.slane %v962_v23, 1  ;;  %v1095_v15 = vadd.f32 %v1094_v48, %v1093_v30 }
 0x185   : > { %v964_v49 = vadd.f32 %v963_v14, %v962_v23  ;;  %v1096_v51 = vrot.slane %v1095_v15, 1 }
 0x187   : > { %v1097_v27 = vadd.f32 %v1096_v51, %v1095_v15  ;;  %1098 = vst [vmem:[%s217_s21] sm:$0xff] %v964_v49 }
 0x189   : > { %1099 = vst [vmem:[%s221_s24] sm:$0xff] %v1097_v27 }
 0x18a PF: > { %s15_s15 = sadd.s32 1, %s1461_s15  }
 0x18b   : > { %p12_p5 = scmp.ge.s32.totalorder %s15_s15, 4  }
 0x18d   :  { %14 = sbr.rel (!%p12_p5) target bundleno = 1 (0x1), region = 82 }

</bundles_post_ra>
